<compile_context>
chip_gen: v5e
topology: v5e:2x2
jax: 0.10.0
libtpu: 0.0.40
codegen_flags: <defaults>
</compile_context>

<pallas_src>
import jax
import jax.numpy as jnp
import numpy as np
from jax import lax
from jax.experimental import pallas as pl
from jax.experimental.pallas import tpu as pltpu

LANE = 128


def _round_up(x, m):
    return (x + m - 1) // m * m


def _pick_batch_tile(N, H, W, Cp, Cwp, vmem_budget=10 * 1024 * 1024):
    """Largest per-step image count NB such that the step's estimated VMEM footprint
    stays under budget, M stays <= 4096 rows, and (when N >= 2) the grid keeps at
    least 2 steps so both v7x TensorCores get work under the 'parallel' axis."""
    Wp = _round_up(W + 2, 8)

    def est(nb):
        m = nb * H * W
        io = 2 * 2 * m * Cp * 4                   # double-buffered x + out tiles (f32)
        scratch = nb * (H + 2) * Wp * Cwp * 2     # bf16 halo scratch
        tmp = m * (Cp * 6 + Cwp * 10)             # rough in-kernel temporaries
        return io + scratch + tmp

    best = 1
    for d in range(1, N + 1):
        if N % d:
            continue
        if N >= 2 and N // d < 2:                 # keep grid >= 2 (v7x megacore)
            continue
        if d * H * W > 4096:                      # per-step matmul-row cap
            continue
        if est(d) > vmem_budget:
            continue
        best = d
    return best


def bottleneck_kernel(x_ref, w1_ref, w2_ref, w3_ref,
                      b1_ref, b2_ref, b3_ref,
                      o_ref, pad_ref):
    """One batch tile (NB images) per grid step, channels padded to 128 (lane-dense).

    x_ref   : (NB, H, W, C)       input tile, NHWC, C = padded Cin (f32)
    w1_ref  : (C, Cw)             conv1 1x1 weights, bn1 scale folded in (bf16)
    w2_ref  : (9, Cw, Cw)         conv2 3x3 weights, one (I,O) block per (ky,kx),
                                  bn2 scale folded in (bf16)
    w3_ref  : (Cw, C)             conv3 1x1 weights, bn3 scale folded in (bf16)
    b*_ref  : (1, C*)             folded eval-mode BatchNorm biases (f32)
    o_ref   : (NB, H, W, C)       output tile (f32), lane-dense store
    pad_ref : VMEM (NB, H+2, Wp, Cw) bf16 halo scratch (Wp = round_up(W+2, 8))
    """
    NB, H, W, C = x_ref.shape
    Cw = w1_ref.shape[1]
    M = NB * H * W

    # Load x once; reused for the bf16 conv1 operand and the f32 residual add.
    xv = x_ref[...]
    x2d = xv.reshape(M, C)

    # ---- conv1 (1x1, bn1 scale folded into w1) + bias + relu ----
    h1 = jnp.dot(x2d.astype(jnp.bfloat16), w1_ref[...],
                 preferred_element_type=jnp.float32)
    h1 = jnp.maximum(h1 + b1_ref[...], 0.0)                       # (M, Cw) f32

    # ---- conv2 (3x3, stride=1, padding=1, bn2 scale folded) + bias + relu ----
    # Halo-only zero of the bf16 scratch (scratch persists across grid steps and the
    # grid axis is "parallel", so it must be re-initialized every step), then write
    # the interior once in bf16 and do 9 accumulating matmuls, one per tap.
    Wp = pad_ref.shape[2]
    zero_row = jnp.zeros((NB, 1, Wp, Cw), jnp.bfloat16)
    pad_ref[:, 0:1, :, :] = zero_row
    pad_ref[:, H + 1:H + 2, :, :] = zero_row
    zero_col = jnp.zeros((NB, H, 1, Cw), jnp.bfloat16)
    pad_ref[:, 1:H + 1, 0:1, :] = zero_col
    pad_ref[:, 1:H + 1, W + 1:W + 2, :] = zero_col
    pad_ref[:, 1:H + 1, 1:W + 1, :] = h1.astype(jnp.bfloat16).reshape(NB, H, W, Cw)

    acc = jnp.zeros((M, Cw), jnp.float32)
    for idx in range(9):                                          # unrolled at trace time
        ky, kx = idx // 3, idx % 3
        tap = pad_ref[:, ky:ky + H, kx:kx + W, :].reshape(M, Cw)  # bf16
        acc = acc + jnp.dot(tap, w2_ref[idx],
                            preferred_element_type=jnp.float32)
    h2 = jnp.maximum(acc + b2_ref[...], 0.0)                      # (M, Cw) f32

    # ---- conv3 (1x1, bn3 scale folded) + bias + residual add + relu ----
    h3 = jnp.dot(h2.astype(jnp.bfloat16), w3_ref[...],
                 preferred_element_type=jnp.float32)
    h3 = h3 + b3_ref[...]
    out = jnp.maximum(h3 + x2d, 0.0)
    o_ref[...] = out.reshape(NB, H, W, C)


@jax.jit
def bottleneck_forward(x_nchw, w1, s1, b1, w2, s2, b2, w3, s3, b3):
    """x_nchw: (N, Cin, H, W) float32. Returns (N, Cout, H, W) float32.

    w1: (Cin, Cw), w2: (3, 3, Cw, Cw) HWIO, w3: (Cw, Cout), s*/b*: (1, C*).
    """
    N, Cin, H, W = x_nchw.shape
    Cw = w1.shape[1]
    Cout = w3.shape[1]
    assert Cin == Cout, "downsample is None -> inplanes must equal planes*expansion"

    Cp = _round_up(Cin, LANE)
    Cwp = _round_up(Cw, LANE)
    Wp = _round_up(W + 2, 8)

    # NCHW -> NHWC plus channel zero-pad (lane-dense HBM layout).  For very narrow
    # channel counts the padded HBM traffic is the roofline; for production ResNet
    # widths (>=64) the lane-dense, unmasked stores win.
    x = jnp.transpose(x_nchw, (0, 2, 3, 1))
    x = jnp.pad(x, ((0, 0), (0, 0), (0, 0), (0, Cp - Cin)))

    # Fold eval-mode BN scales into the conv weights (per output channel), then pad
    # channels (zeros keep padded lanes zero end-to-end) and cast to bf16.
    w1f = w1 * s1                       # (Cin, Cw) * (1, Cw)
    w2f = w2 * s2[0]                    # HWIO: scale broadcasts over last (O) axis
    w3f = w3 * s3                       # (Cw, Cout) * (1, Cout)

    w1p = jnp.pad(w1f, ((0, Cp - Cin), (0, Cwp - Cw))).astype(jnp.bfloat16)
    w2p = jnp.pad(w2f, ((0, 0), (0, 0), (0, Cwp - Cw), (0, Cwp - Cw)))
    w2p = w2p.reshape(9, Cwp, Cwp).astype(jnp.bfloat16)
    w3p = jnp.pad(w3f, ((0, Cwp - Cw), (0, Cp - Cout))).astype(jnp.bfloat16)

    padc = lambda a, c: jnp.pad(a, ((0, 0), (0, c - a.shape[1])))
    b1p, b2p, b3p = padc(b1, Cwp), padc(b2, Cwp), padc(b3, Cp)

    NB = _pick_batch_tile(N, H, W, Cp, Cwp)
    grid = (N // NB,)

    def full(a):
        nd = a.ndim
        return pl.BlockSpec(a.shape, lambda n, _nd=nd: (0,) * _nd)

    out_nhwc = pl.pallas_call(
        bottleneck_kernel,
        out_shape=jax.ShapeDtypeStruct((N, H, W, Cp), jnp.float32),
        grid_spec=pltpu.PrefetchScalarGridSpec(
            num_scalar_prefetch=0,
            grid=grid,
            in_specs=[
                pl.BlockSpec((NB, H, W, Cp), lambda n: (n, 0, 0, 0)),
                full(w1p), full(w2p), full(w3p),
                full(b1p), full(b2p), full(b3p),
            ],
            out_specs=pl.BlockSpec((NB, H, W, Cp), lambda n: (n, 0, 0, 0)),
            scratch_shapes=[pltpu.VMEM((NB, H + 2, Wp, Cwp), jnp.bfloat16)],
        ),
        compiler_params=pltpu.CompilerParams(
            dimension_semantics=("parallel",),
            vmem_limit_bytes=32 * 1024 * 1024),
    )(x, w1p, w2p, w3p, b1p, b2p, b3p)

    out = out_nhwc[..., :Cout]
    return jnp.transpose(out, (0, 3, 1, 2))                       # back to NCHW


def reference_forward(x_nchw, w1, s1, b1, w2, s2, b2, w3, s3, b3):
    """Pure-JAX f32 reference (XLA convs, unfolded BN) for correctness checking."""
    x = jnp.transpose(x_nchw, (0, 2, 3, 1))                       # NHWC
    dn = ('NHWC', 'HWIO', 'NHWC')
    h = jnp.einsum('nhwc,cd->nhwd', x, w1)
    h = jnp.maximum(h * s1[0] + b1[0], 0.0)
    h = lax.conv_general_dilated(h, w2, window_strides=(1, 1),
                                 padding=((1, 1), (1, 1)),
                                 dimension_numbers=dn)
    h = jnp.maximum(h * s2[0] + b2[0], 0.0)
    h = jnp.einsum('nhwc,cd->nhwd', h, w3)
    h = h * s3[0] + b3[0]
    out = jnp.maximum(h + x, 0.0)
    return jnp.transpose(out, (0, 3, 1, 2))


def make_bn_scale_bias(key, c, eps=1e-5):
    k1, k2, k3, k4 = jax.random.split(key, 4)
    gamma = jax.random.uniform(k1, (c,), jnp.float32, 0.5, 1.5)
    beta = jax.random.normal(k2, (c,), jnp.float32) * 0.1
    running_mean = jax.random.normal(k3, (c,), jnp.float32) * 0.1
    running_var = jax.random.uniform(k4, (c,), jnp.float32, 0.5, 1.5)
    scale = gamma / jnp.sqrt(running_var + eps)
    bias = beta - running_mean * scale
    return scale.reshape(1, c), bias.reshape(1, c)


if __name__ == "__main__":
    # Module configuration (defaults): stride=1, groups=1, base_width=64,
    # dilation=1, downsample=None.  planes=8 -> width=8, out channels=32,
    # inplanes must be 32 for the identity residual to type-check.
    N, H, W = 2, 8, 8
    planes = 8
    inplanes = planes * 4          # 32
    width = planes                 # int(planes * (64/64)) * 1
    cout = planes * 4              # 32

    key = jax.random.PRNGKey(0)
    kx, kw1, kw2, kw3, kb1, kb2, kb3 = jax.random.split(key, 7)

    x = jax.random.normal(kx, (N, inplanes, H, W), jnp.float32)

    # Conv weights generated directly in the wrapper's expected layouts:
    #   conv1: PyTorch (width, inplanes, 1, 1) OIHW  ->  (inplanes, width)  [I, O]
    #   conv2: PyTorch (width, width, 3, 3)    OIHW  ->  (3, 3, width, width) HWIO
    #   conv3: PyTorch (cout, width, 1, 1)     OIHW  ->  (width, cout)      [I, O]
    w1 = jax.random.normal(kw1, (inplanes, width), jnp.float32) * 0.1
    w2 = jax.random.normal(kw2, (3, 3, width, width), jnp.float32) * 0.1
    w3 = jax.random.normal(kw3, (width, cout), jnp.float32) * 0.1

    # Eval-mode BatchNorm folded into per-channel scale/bias.
    s1, b1 = make_bn_scale_bias(kb1, width)
    s2, b2 = make_bn_scale_bias(kb2, width)
    s3, b3 = make_bn_scale_bias(kb3, cout)

    out = bottleneck_forward(x, w1, s1, b1, w2, s2, b2, w3, s3, b3)
    out = jax.block_until_ready(out)

    ref = reference_forward(x, w1, s1, b1, w2, s2, b2, w3, s3, b3)
    # bf16 MXU inputs with folded BN scales (f32 accumulation) vs. f32 reference.
    np.testing.assert_allclose(np.asarray(out), np.asarray(ref),
                               rtol=2e-2, atol=2e-2)

    print("KERNEL_OK")
</pallas_src>

<mosaic_0001>
module attributes {stable_mosaic.version = 11 : i64} {
  func.func @bottleneck_kernel(%arg0: i32, %arg1: memref<1x8x8x128xf32, #tpu.memory_space<vmem>>, %arg2: memref<128x128xbf16, #tpu.memory_space<vmem>>, %arg3: memref<9x128x128xbf16, #tpu.memory_space<vmem>>, %arg4: memref<128x128xbf16, #tpu.memory_space<vmem>>, %arg5: memref<1x128xf32, #tpu.memory_space<vmem>>, %arg6: memref<1x128xf32, #tpu.memory_space<vmem>>, %arg7: memref<1x128xf32, #tpu.memory_space<vmem>>, %arg8: memref<1x8x8x128xf32, #tpu.memory_space<vmem>>, %arg9: memref<1x10x16x128xbf16, #tpu.memory_space<vmem>>) attributes {dimension_semantics = [#tpu.dimension_semantics<parallel>], iteration_bounds = array<i64: 2>, scalar_prefetch = 0 : i64, scratch_operands = 1 : i64, tpu.core_type = #tpu.core_type<tc>, window_params = [{transform_indices = @transform_0, window_bounds = array<i64: 1, 8, 8, 128>}, {pipeline_mode = #tpu.pipeline_mode<synchronous>, transform_indices = @transform_1, window_bounds = array<i64: 128, 128>}, {pipeline_mode = #tpu.pipeline_mode<synchronous>, transform_indices = @transform_2, window_bounds = array<i64: 9, 128, 128>}, {pipeline_mode = #tpu.pipeline_mode<synchronous>, transform_indices = @transform_3, window_bounds = array<i64: 128, 128>}, {pipeline_mode = #tpu.pipeline_mode<synchronous>, transform_indices = @transform_4, window_bounds = array<i64: 1, 128>}, {pipeline_mode = #tpu.pipeline_mode<synchronous>, transform_indices = @transform_5, window_bounds = array<i64: 1, 128>}, {pipeline_mode = #tpu.pipeline_mode<synchronous>, transform_indices = @transform_6, window_bounds = array<i64: 1, 128>}, {transform_indices = @transform_7, window_bounds = array<i64: 1, 8, 8, 128>}]} {
    %c0 = arith.constant 0 : index
    %c0_0 = arith.constant 0 : index
    %c0_1 = arith.constant 0 : index
    %c0_2 = arith.constant 0 : index
    %0 = vector.load %arg1[%c0, %c0_0, %c0_1, %c0_2] : memref<1x8x8x128xf32, #tpu.memory_space<vmem>>, vector<1x8x8x128xf32>
    %1 = vector.shape_cast %0 : vector<1x8x8x128xf32> to vector<64x128xf32>
    %2 = arith.truncf %1 : vector<64x128xf32> to vector<64x128xbf16>
    %c0_3 = arith.constant 0 : index
    %c0_4 = arith.constant 0 : index
    %3 = vector.load %arg2[%c0_3, %c0_4] : memref<128x128xbf16, #tpu.memory_space<vmem>>, vector<128x128xbf16>
    %cst = arith.constant dense<0.000000e+00> : vector<64x128xf32>
    %4 = tpu.matmul %2, %3, %cst {dimension_numbers = #tpu.dot_dimension_numbers<[1], [0], [0], [1], [0, 0, 1, 1], [], []>} : vector<64x128xbf16>, vector<128x128xbf16>, vector<64x128xf32> -> vector<64x128xf32>
    %c0_5 = arith.constant 0 : index
    %c0_6 = arith.constant 0 : index
    %5 = vector.load %arg5[%c0_5, %c0_6] : memref<1x128xf32, #tpu.memory_space<vmem>>, vector<1x128xf32>
    %6 = vector.broadcast %5 : vector<1x128xf32> to vector<64x128xf32>
    %7 = arith.addf %4, %6 : vector<64x128xf32>
    %cst_7 = arith.constant 0.000000e+00 : f32
    %8 = vector.broadcast %cst_7 : f32 to vector<64x128xf32>
    %9 = arith.maximumf %7, %8 : vector<64x128xf32>
    %cst_8 = arith.constant 0.000000e+00 : bf16
    %10 = vector.broadcast %cst_8 : bf16 to vector<1x1x16x128xbf16>
    %c0_9 = arith.constant 0 : index
    %c0_10 = arith.constant 0 : index
    %c0_11 = arith.constant 0 : index
    %c0_12 = arith.constant 0 : index
    %11 = vector.load %arg9[%c0_9, %c0_10, %c0_11, %c0_12] : memref<1x10x16x128xbf16, #tpu.memory_space<vmem>>, vector<1x1x16x128xbf16>
    tpu.vector_store %arg9[%c0_9, %c0_10, %c0_11, %c0_12], %10 {strides = array<i32>} : memref<1x10x16x128xbf16, #tpu.memory_space<vmem>>, vector<1x1x16x128xbf16>,
    %c0_13 = arith.constant 0 : index
    %c9 = arith.constant 9 : index
    %c0_14 = arith.constant 0 : index
    %c0_15 = arith.constant 0 : index
    %12 = vector.load %arg9[%c0_13, %c9, %c0_14, %c0_15] : memref<1x10x16x128xbf16, #tpu.memory_space<vmem>>, vector<1x1x16x128xbf16>
    tpu.vector_store %arg9[%c0_13, %c9, %c0_14, %c0_15], %10 {strides = array<i32>} : memref<1x10x16x128xbf16, #tpu.memory_space<vmem>>, vector<1x1x16x128xbf16>,
    %cst_16 = arith.constant 0.000000e+00 : bf16
    %13 = vector.broadcast %cst_16 : bf16 to vector<1x8x1x128xbf16>
    %c0_17 = arith.constant 0 : index
    %c1 = arith.constant 1 : index
    %c0_18 = arith.constant 0 : index
    %c0_19 = arith.constant 0 : index
    %14 = vector.load %arg9[%c0_17, %c1, %c0_18, %c0_19] : memref<1x10x16x128xbf16, #tpu.memory_space<vmem>>, vector<1x8x1x128xbf16>
    tpu.vector_store %arg9[%c0_17, %c1, %c0_18, %c0_19], %13 {strides = array<i32>} : memref<1x10x16x128xbf16, #tpu.memory_space<vmem>>, vector<1x8x1x128xbf16>,
    %c0_20 = arith.constant 0 : index
    %c1_21 = arith.constant 1 : index
    %c9_22 = arith.constant 9 : index
    %c0_23 = arith.constant 0 : index
    %15 = vector.load %arg9[%c0_20, %c1_21, %c9_22, %c0_23] : memref<1x10x16x128xbf16, #tpu.memory_space<vmem>>, vector<1x8x1x128xbf16>
    tpu.vector_store %arg9[%c0_20, %c1_21, %c9_22, %c0_23], %13 {strides = array<i32>} : memref<1x10x16x128xbf16, #tpu.memory_space<vmem>>, vector<1x8x1x128xbf16>,
    %16 = arith.truncf %9 : vector<64x128xf32> to vector<64x128xbf16>
    %17 = vector.shape_cast %16 : vector<64x128xbf16> to vector<1x8x8x128xbf16>
    %c0_24 = arith.constant 0 : index
    %c1_25 = arith.constant 1 : index
    %c1_26 = arith.constant 1 : index
    %c0_27 = arith.constant 0 : index
    %18 = vector.load %arg9[%c0_24, %c1_25, %c1_26, %c0_27] : memref<1x10x16x128xbf16, #tpu.memory_space<vmem>>, vector<1x8x8x128xbf16>
    tpu.vector_store %arg9[%c0_24, %c1_25, %c1_26, %c0_27], %17 {strides = array<i32>} : memref<1x10x16x128xbf16, #tpu.memory_space<vmem>>, vector<1x8x8x128xbf16>,
    %cst_28 = arith.constant 0.000000e+00 : f32
    %19 = vector.broadcast %cst_28 : f32 to vector<64x128xf32>
    %c0_29 = arith.constant 0 : index
    %c0_30 = arith.constant 0 : index
    %c0_31 = arith.constant 0 : index
    %c0_32 = arith.constant 0 : index
    %20 = vector.load %arg9[%c0_29, %c0_30, %c0_31, %c0_32] : memref<1x10x16x128xbf16, #tpu.memory_space<vmem>>, vector<1x8x8x128xbf16>
    %21 = vector.shape_cast %20 : vector<1x8x8x128xbf16> to vector<64x128xbf16>
    %c0_33 = arith.constant 0 : index
    %c0_34 = arith.constant 0 : index
    %c0_35 = arith.constant 0 : index
    %22 = vector.load %arg3[%c0_33, %c0_34, %c0_35] : memref<9x128x128xbf16, #tpu.memory_space<vmem>>, vector<1x128x128xbf16>
    %23 = vector.shape_cast %22 : vector<1x128x128xbf16> to vector<128x128xbf16>
    %cst_36 = arith.constant dense<0.000000e+00> : vector<64x128xf32>
    %24 = tpu.matmul %21, %23, %cst_36 {dimension_numbers = #tpu.dot_dimension_numbers<[1], [0], [0], [1], [0, 0, 1, 1], [], []>} : vector<64x128xbf16>, vector<128x128xbf16>, vector<64x128xf32> -> vector<64x128xf32>
    %25 = arith.addf %19, %24 : vector<64x128xf32>
    %c0_37 = arith.constant 0 : index
    %c0_38 = arith.constant 0 : index
    %c1_39 = arith.constant 1 : index
    %c0_40 = arith.constant 0 : index
    %26 = vector.load %arg9[%c0_37, %c0_38, %c1_39, %c0_40] : memref<1x10x16x128xbf16, #tpu.memory_space<vmem>>, vector<1x8x8x128xbf16>
    %27 = vector.shape_cast %26 : vector<1x8x8x128xbf16> to vector<64x128xbf16>
    %c1_41 = arith.constant 1 : index
    %c0_42 = arith.constant 0 : index
    %c0_43 = arith.constant 0 : index
    %28 = vector.load %arg3[%c1_41, %c0_42, %c0_43] : memref<9x128x128xbf16, #tpu.memory_space<vmem>>, vector<1x128x128xbf16>
    %29 = vector.shape_cast %28 : vector<1x128x128xbf16> to vector<128x128xbf16>
    %cst_44 = arith.constant dense<0.000000e+00> : vector<64x128xf32>
    %30 = tpu.matmul %27, %29, %cst_44 {dimension_numbers = #tpu.dot_dimension_numbers<[1], [0], [0], [1], [0, 0, 1, 1], [], []>} : vector<64x128xbf16>, vector<128x128xbf16>, vector<64x128xf32> -> vector<64x128xf32>
    %31 = arith.addf %25, %30 : vector<64x128xf32>
    %c0_45 = arith.constant 0 : index
    %c0_46 = arith.constant 0 : index
    %c2 = arith.constant 2 : index
    %c0_47 = arith.constant 0 : index
    %32 = vector.load %arg9[%c0_45, %c0_46, %c2, %c0_47] : memref<1x10x16x128xbf16, #tpu.memory_space<vmem>>, vector<1x8x8x128xbf16>
    %33 = vector.shape_cast %32 : vector<1x8x8x128xbf16> to vector<64x128xbf16>
    %c2_48 = arith.constant 2 : index
    %c0_49 = arith.constant 0 : index
    %c0_50 = arith.constant 0 : index
    %34 = vector.load %arg3[%c2_48, %c0_49, %c0_50] : memref<9x128x128xbf16, #tpu.memory_space<vmem>>, vector<1x128x128xbf16>
    %35 = vector.shape_cast %34 : vector<1x128x128xbf16> to vector<128x128xbf16>
    %cst_51 = arith.constant dense<0.000000e+00> : vector<64x128xf32>
    %36 = tpu.matmul %33, %35, %cst_51 {dimension_numbers = #tpu.dot_dimension_numbers<[1], [0], [0], [1], [0, 0, 1, 1], [], []>} : vector<64x128xbf16>, vector<128x128xbf16>, vector<64x128xf32> -> vector<64x128xf32>
    %37 = arith.addf %31, %36 : vector<64x128xf32>
    %c0_52 = arith.constant 0 : index
    %c1_53 = arith.constant 1 : index
    %c0_54 = arith.constant 0 : index
    %c0_55 = arith.constant 0 : index
    %38 = vector.load %arg9[%c0_52, %c1_53, %c0_54, %c0_55] : memref<1x10x16x128xbf16, #tpu.memory_space<vmem>>, vector<1x8x8x128xbf16>
    %39 = vector.shape_cast %38 : vector<1x8x8x128xbf16> to vector<64x128xbf16>
    %c3 = arith.constant 3 : index
    %c0_56 = arith.constant 0 : index
    %c0_57 = arith.constant 0 : index
    %40 = vector.load %arg3[%c3, %c0_56, %c0_57] : memref<9x128x128xbf16, #tpu.memory_space<vmem>>, vector<1x128x128xbf16>
    %41 = vector.shape_cast %40 : vector<1x128x128xbf16> to vector<128x128xbf16>
    %cst_58 = arith.constant dense<0.000000e+00> : vector<64x128xf32>
    %42 = tpu.matmul %39, %41, %cst_58 {dimension_numbers = #tpu.dot_dimension_numbers<[1], [0], [0], [1], [0, 0, 1, 1], [], []>} : vector<64x128xbf16>, vector<128x128xbf16>, vector<64x128xf32> -> vector<64x128xf32>
    %43 = arith.addf %37, %42 : vector<64x128xf32>
    %c0_59 = arith.constant 0 : index
    %c1_60 = arith.constant 1 : index
    %c1_61 = arith.constant 1 : index
    %c0_62 = arith.constant 0 : index
    %44 = vector.load %arg9[%c0_59, %c1_60, %c1_61, %c0_62] : memref<1x10x16x128xbf16, #tpu.memory_space<vmem>>, vector<1x8x8x128xbf16>
    %45 = vector.shape_cast %44 : vector<1x8x8x128xbf16> to vector<64x128xbf16>
    %c4 = arith.constant 4 : index
    %c0_63 = arith.constant 0 : index
    %c0_64 = arith.constant 0 : index
    %46 = vector.load %arg3[%c4, %c0_63, %c0_64] : memref<9x128x128xbf16, #tpu.memory_space<vmem>>, vector<1x128x128xbf16>
    %47 = vector.shape_cast %46 : vector<1x128x128xbf16> to vector<128x128xbf16>
    %cst_65 = arith.constant dense<0.000000e+00> : vector<64x128xf32>
    %48 = tpu.matmul %45, %47, %cst_65 {dimension_numbers = #tpu.dot_dimension_numbers<[1], [0], [0], [1], [0, 0, 1, 1], [], []>} : vector<64x128xbf16>, vector<128x128xbf16>, vector<64x128xf32> -> vector<64x128xf32>
    %49 = arith.addf %43, %48 : vector<64x128xf32>
    %c0_66 = arith.constant 0 : index
    %c1_67 = arith.constant 1 : index
    %c2_68 = arith.constant 2 : index
    %c0_69 = arith.constant 0 : index
    %50 = vector.load %arg9[%c0_66, %c1_67, %c2_68, %c0_69] : memref<1x10x16x128xbf16, #tpu.memory_space<vmem>>, vector<1x8x8x128xbf16>
    %51 = vector.shape_cast %50 : vector<1x8x8x128xbf16> to vector<64x128xbf16>
    %c5 = arith.constant 5 : index
    %c0_70 = arith.constant 0 : index
    %c0_71 = arith.constant 0 : index
    %52 = vector.load %arg3[%c5, %c0_70, %c0_71] : memref<9x128x128xbf16, #tpu.memory_space<vmem>>, vector<1x128x128xbf16>
    %53 = vector.shape_cast %52 : vector<1x128x128xbf16> to vector<128x128xbf16>
    %cst_72 = arith.constant dense<0.000000e+00> : vector<64x128xf32>
    %54 = tpu.matmul %51, %53, %cst_72 {dimension_numbers = #tpu.dot_dimension_numbers<[1], [0], [0], [1], [0, 0, 1, 1], [], []>} : vector<64x128xbf16>, vector<128x128xbf16>, vector<64x128xf32> -> vector<64x128xf32>
    %55 = arith.addf %49, %54 : vector<64x128xf32>
    %c0_73 = arith.constant 0 : index
    %c2_74 = arith.constant 2 : index
    %c0_75 = arith.constant 0 : index
    %c0_76 = arith.constant 0 : index
    %56 = vector.load %arg9[%c0_73, %c2_74, %c0_75, %c0_76] : memref<1x10x16x128xbf16, #tpu.memory_space<vmem>>, vector<1x8x8x128xbf16>
    %57 = vector.shape_cast %56 : vector<1x8x8x128xbf16> to vector<64x128xbf16>
    %c6 = arith.constant 6 : index
    %c0_77 = arith.constant 0 : index
    %c0_78 = arith.constant 0 : index
    %58 = vector.load %arg3[%c6, %c0_77, %c0_78] : memref<9x128x128xbf16, #tpu.memory_space<vmem>>, vector<1x128x128xbf16>
    %59 = vector.shape_cast %58 : vector<1x128x128xbf16> to vector<128x128xbf16>
    %cst_79 = arith.constant dense<0.000000e+00> : vector<64x128xf32>
    %60 = tpu.matmul %57, %59, %cst_79 {dimension_numbers = #tpu.dot_dimension_numbers<[1], [0], [0], [1], [0, 0, 1, 1], [], []>} : vector<64x128xbf16>, vector<128x128xbf16>, vector<64x128xf32> -> vector<64x128xf32>
    %61 = arith.addf %55, %60 : vector<64x128xf32>
    %c0_80 = arith.constant 0 : index
    %c2_81 = arith.constant 2 : index
    %c1_82 = arith.constant 1 : index
    %c0_83 = arith.constant 0 : index
    %62 = vector.load %arg9[%c0_80, %c2_81, %c1_82, %c0_83] : memref<1x10x16x128xbf16, #tpu.memory_space<vmem>>, vector<1x8x8x128xbf16>
    %63 = vector.shape_cast %62 : vector<1x8x8x128xbf16> to vector<64x128xbf16>
    %c7 = arith.constant 7 : index
    %c0_84 = arith.constant 0 : index
    %c0_85 = arith.constant 0 : index
    %64 = vector.load %arg3[%c7, %c0_84, %c0_85] : memref<9x128x128xbf16, #tpu.memory_space<vmem>>, vector<1x128x128xbf16>
    %65 = vector.shape_cast %64 : vector<1x128x128xbf16> to vector<128x128xbf16>
    %cst_86 = arith.constant dense<0.000000e+00> : vector<64x128xf32>
    %66 = tpu.matmul %63, %65, %cst_86 {dimension_numbers = #tpu.dot_dimension_numbers<[1], [0], [0], [1], [0, 0, 1, 1], [], []>} : vector<64x128xbf16>, vector<128x128xbf16>, vector<64x128xf32> -> vector<64x128xf32>
    %67 = arith.addf %61, %66 : vector<64x128xf32>
    %c0_87 = arith.constant 0 : index
    %c2_88 = arith.constant 2 : index
    %c2_89 = arith.constant 2 : index
    %c0_90 = arith.constant 0 : index
    %68 = vector.load %arg9[%c0_87, %c2_88, %c2_89, %c0_90] : memref<1x10x16x128xbf16, #tpu.memory_space<vmem>>, vector<1x8x8x128xbf16>
    %69 = vector.shape_cast %68 : vector<1x8x8x128xbf16> to vector<64x128xbf16>
    %c8 = arith.constant 8 : index
    %c0_91 = arith.constant 0 : index
    %c0_92 = arith.constant 0 : index
    %70 = vector.load %arg3[%c8, %c0_91, %c0_92] : memref<9x128x128xbf16, #tpu.memory_space<vmem>>, vector<1x128x128xbf16>
    %71 = vector.shape_cast %70 : vector<1x128x128xbf16> to vector<128x128xbf16>
    %cst_93 = arith.constant dense<0.000000e+00> : vector<64x128xf32>
    %72 = tpu.matmul %69, %71, %cst_93 {dimension_numbers = #tpu.dot_dimension_numbers<[1], [0], [0], [1], [0, 0, 1, 1], [], []>} : vector<64x128xbf16>, vector<128x128xbf16>, vector<64x128xf32> -> vector<64x128xf32>
    %73 = arith.addf %67, %72 : vector<64x128xf32>
    %c0_94 = arith.constant 0 : index
    %c0_95 = arith.constant 0 : index
    %74 = vector.load %arg6[%c0_94, %c0_95] : memref<1x128xf32, #tpu.memory_space<vmem>>, vector<1x128xf32>
    %75 = vector.broadcast %74 : vector<1x128xf32> to vector<64x128xf32>
    %76 = arith.addf %73, %75 : vector<64x128xf32>
    %cst_96 = arith.constant 0.000000e+00 : f32
    %77 = vector.broadcast %cst_96 : f32 to vector<64x128xf32>
    %78 = arith.maximumf %76, %77 : vector<64x128xf32>
    %79 = arith.truncf %78 : vector<64x128xf32> to vector<64x128xbf16>
    %c0_97 = arith.constant 0 : index
    %c0_98 = arith.constant 0 : index
    %80 = vector.load %arg4[%c0_97, %c0_98] : memref<128x128xbf16, #tpu.memory_space<vmem>>, vector<128x128xbf16>
    %cst_99 = arith.constant dense<0.000000e+00> : vector<64x128xf32>
    %81 = tpu.matmul %79, %80, %cst_99 {dimension_numbers = #tpu.dot_dimension_numbers<[1], [0], [0], [1], [0, 0, 1, 1], [], []>} : vector<64x128xbf16>, vector<128x128xbf16>, vector<64x128xf32> -> vector<64x128xf32>
    %c0_100 = arith.constant 0 : index
    %c0_101 = arith.constant 0 : index
    %82 = vector.load %arg7[%c0_100, %c0_101] : memref<1x128xf32, #tpu.memory_space<vmem>>, vector<1x128xf32>
    %83 = vector.broadcast %82 : vector<1x128xf32> to vector<64x128xf32>
    %84 = arith.addf %81, %83 : vector<64x128xf32>
    %85 = arith.addf %84, %1 : vector<64x128xf32>
    %cst_102 = arith.constant 0.000000e+00 : f32
    %86 = vector.broadcast %cst_102 : f32 to vector<64x128xf32>
    %87 = arith.maximumf %85, %86 : vector<64x128xf32>
    %88 = vector.shape_cast %87 : vector<64x128xf32> to vector<1x8x8x128xf32>
    %c0_103 = arith.constant 0 : index
    %c0_104 = arith.constant 0 : index
    %c0_105 = arith.constant 0 : index
    %c0_106 = arith.constant 0 : index
    %89 = vector.load %arg8[%c0_103, %c0_104, %c0_105, %c0_106] : memref<1x8x8x128xf32, #tpu.memory_space<vmem>>, vector<1x8x8x128xf32>
    tpu.vector_store %arg8[%c0_103, %c0_104, %c0_105, %c0_106], %88 {strides = array<i32>} : memref<1x8x8x128xf32, #tpu.memory_space<vmem>>, vector<1x8x8x128xf32>,
    return
  }
  func.func @transform_0(%arg0: i32) -> (i32, i32, i32, i32) {
    %c0_i32 = arith.constant 0 : i32
    %c0_i32_0 = arith.constant 0 : i32
    %c0_i32_1 = arith.constant 0 : i32
    %c0_i32_2 = arith.constant 0 : i32
    return %arg0, %c0_i32, %c0_i32_0, %c0_i32_1 : i32, i32, i32, i32
  }
  func.func @transform_1(%arg0: i32) -> (i32, i32) {
    %c0_i32 = arith.constant 0 : i32
    %c0_i32_0 = arith.constant 0 : i32
    %c0_i32_1 = arith.constant 0 : i32
    return %c0_i32, %c0_i32_0 : i32, i32
  }
  func.func @transform_2(%arg0: i32) -> (i32, i32, i32) {
    %c0_i32 = arith.constant 0 : i32
    %c0_i32_0 = arith.constant 0 : i32
    %c0_i32_1 = arith.constant 0 : i32
    %c0_i32_2 = arith.constant 0 : i32
    return %c0_i32, %c0_i32_0, %c0_i32_1 : i32, i32, i32
  }
  func.func @transform_3(%arg0: i32) -> (i32, i32) {
    %c0_i32 = arith.constant 0 : i32
    %c0_i32_0 = arith.constant 0 : i32
    %c0_i32_1 = arith.constant 0 : i32
    return %c0_i32, %c0_i32_0 : i32, i32
  }
  func.func @transform_4(%arg0: i32) -> (i32, i32) {
    %c0_i32 = arith.constant 0 : i32
    %c0_i32_0 = arith.constant 0 : i32
    %c0_i32_1 = arith.constant 0 : i32
    return %c0_i32, %c0_i32_0 : i32, i32
  }
  func.func @transform_5(%arg0: i32) -> (i32, i32) {
    %c0_i32 = arith.constant 0 : i32
    %c0_i32_0 = arith.constant 0 : i32
    %c0_i32_1 = arith.constant 0 : i32
    return %c0_i32, %c0_i32_0 : i32, i32
  }
  func.func @transform_6(%arg0: i32) -> (i32, i32) {
    %c0_i32 = arith.constant 0 : i32
    %c0_i32_0 = arith.constant 0 : i32
    %c0_i32_1 = arith.constant 0 : i32
    return %c0_i32, %c0_i32_0 : i32, i32
  }
  func.func @transform_7(%arg0: i32) -> (i32, i32, i32, i32) {
    %c0_i32 = arith.constant 0 : i32
    %c0_i32_0 = arith.constant 0 : i32
    %c0_i32_1 = arith.constant 0 : i32
    %c0_i32_2 = arith.constant 0 : i32
    return %arg0, %c0_i32, %c0_i32_0, %c0_i32_1 : i32, i32, i32, i32
  }
}

</mosaic_0001>

<bundles_post_ra>
// kernel: bottleneck_forward.1
= control target key start
LH: loop header
LB: loop body
LE: loop exit
PB: predicated region body
PF: predicated region fallthrough
CT: control target
= control target key end

     0   :  { %s3196_s24 = smov 0   ;;  %s3838_s0 = inlined_call_operand.vmem [shape: f32[2,8,8,128], index: 0, kind: input, shape index: {}]   ;;  %s3839_s1 = inlined_call_operand.vmem [shape: bf16[128,128], index: 1, kind: input, shape index: {}]   ;;  %s3840_s2 = inlined_call_operand.vmem [shape: bf16[9,128,128], index: 2, kind: input, shape index: {}]   ;;  %s3841_s3 = inlined_call_operand.vmem [shape: bf16[128,128], index: 3, kind: input, shape index: {}]   ;;  %s3842_s4 = inlined_call_operand.vmem [shape: f32[1,128], index: 4, kind: input, shape index: {}]   ;;  %s3843_s5 = inlined_call_operand.vmem [shape: f32[1,128], index: 5, kind: input, shape index: {}]   ;;  %s3844_s6 = inlined_call_operand.vmem [shape: f32[1,128], index: 6, kind: input, shape index: {}]   ;;  %s3845_s7 = inlined_call_operand.vmem [shape: f32[2,8,8,128], index: 7, kind: output, shape index: {}]  }
   0x1 LB: > { %s2438_s25 = sadd.s32 4294967295, %s3153_s24   ;;  %p2442_p0 = scmp.ge.s32.totalorder %s3153_s24, 1  ;;  %s3153_s24 = sphi %s3196_s24, %s17_s24  }
   0x2   : > { %p237_p1 = scmp.lt.s32.totalorder %s3153_s24, 3 }
   0x4   : > { %p238_p2 = pnand %p2442_p0, %p237_p1 }
   0x5   : > { %p269_p3 = scmp.lt.s32.totalorder (!%p238_p2), %s2438_s25, 1 }
   0x6   : > { %241 = sbr.rel (%p238_p2) target bundleno = 659 (0x293), region = 48 }
   0xb   : > { %v3010_v0 = vld [vmem:[%s3839_s1 + $0x38] sm:$0xff]  ;;  %v3009_v1 = vld [vmem:[%s3839_s1 + $0x30] sm:$0xff]  ;;  %v3008_v2 = vld [vmem:[%s3839_s1 + $0x28] sm:$0xff]  ;;  %s3857_s25 = smov (!%p269_p3, %s2438_s25), 1  ;;  %vm403_vm0 = vcmask 1040384   ;;  %v3155_v49 = vmov 0  }
   0xc   : > { %360 = vmatpush.bf16.msra.mxu0 %v3010_v0  ;;  %3103 = vmatpush.bf16.msra.mxu3 %v3010_v0  ;;  %v3007_v3 = vld [vmem:[%s3839_s1 + $0x20] sm:$0xff]  ;;  %v3006_v4 = vld [vmem:[%s3839_s1 + $0x18] sm:$0xff]  ;;  %v3005_v6 = vld [vmem:[%s3839_s1 + $0x10] sm:$0xff]  ;;  %s3001_s17 = sshll.u32 %s3857_s25, 6  ;;  %vm404_vm1 = vsmask.f32 256 }
   0xd   : > { %v3022_v5 = vld [vmem:[%s3840_s2 + $0x38] sm:$0xff]  ;;  %v3021_v7 = vld [vmem:[%s3840_s2 + $0x30] sm:$0xff]  ;;  %v3004_v8 = vld [vmem:[%s3839_s1 + $0x8] sm:$0xff]  ;;  %s3239_s26 = scalar_lea.vmem %s3838_s0, %s3001_s17  ;;  %vm430_vm2 = vsmask.f32 7938  ;;  %vm544_vm5 = vcmask 1043456   ;;  %s3818_s19 = scalar_lea.vmem %s3845_s7, %s3001_s17 }
   0xe   : > { %923 = vmatpush.bf16.msra.mxu2 %v3022_v5  ;;  %v3003_v9 = vld [vmem:[%s3839_s1] sm:$0xff]  ;;  %v281_v11 = vld [vmem:[%s3239_s26 + $0x8] sm:$0xff]  ;;  %v3038_v14 = vld [vmem:[%s3840_s2 + $0xb8] sm:$0xff]  ;;  %397 = vst [vmem:[#allocation2] sm:$0xf] %v3155_v49  ;;  %vm976_vm6 = vcmask 1042432  }
   0xf   : > { %v280_v10 = vld [vmem:[%s3239_s26] sm:$0xff]  ;;  %v285_v13 = vld [vmem:[%s3239_s26 + $0x28] sm:$0xff]  ;;  %v282_v17 = vld [vmem:[%s3239_s26 + $0x10] sm:$0xff]  ;;  %398 = vst [vmem:[#allocation2 + $0x4] sm:$0xf] %v3155_v49  ;;  %vm977_vm7 = vcmask 1046532  }
  0x10   : > { %361 = vmatpush.bf16.msra.mxu0 %v3009_v1  ;;  %3104 = vmatpush.bf16.msra.mxu3 %v3009_v1  ;;  %v284_v12 = vld [vmem:[%s3239_s26 + $0x20] sm:$0xff]  ;;  %v288_v15 = vpack.c.bf16 %v281_v11, %v280_v10  ;;  %v283_v18 = vld [vmem:[%s3239_s26 + $0x18] sm:$0xff]  ;;  %v286_v19 = vld [vmem:[%s3239_s26 + $0x30] sm:$0xff]  ;;  %400 = vst [vmem:[#allocation2 + $0x48] sm:$0xf] %v3155_v49 }
  0x11   : > { %v290_v16 = vpack.c.bf16 %v285_v13, %v284_v12  ;;  %v287_v20 = vld [vmem:[%s3239_s26 + $0x38] sm:$0xff]  ;;  %v289_v21 = vpack.c.bf16 %v283_v18, %v282_v17  ;;  %v3020_v23 = vld [vmem:[%s3840_s2 + $0x28] sm:$0xff]  ;;  %v3037_v25 = vld [vmem:[%s3840_s2 + $0xb0] sm:$0xff]  ;;  %401 = vst [vmem:[#allocation2 + $0x4c] sm:$0xf] %v3155_v49 }
  0x12   : > { %924 = vmatpush.bf16.msra.mxu2 %v3021_v7  ;;  %v291_v22 = vpack.c.bf16 %v287_v20, %v286_v19  ;;  %v3050_v24 = vld [vmem:[%s3840_s2 + $0xf8] sm:$0xff]  ;;  %vm3264_vm3 = vmand %vm403_vm0, %vm404_vm1  ;;  %v406_v27 = vld [vmem:[#allocation2 + $0x8] sm:$0x1]  ;;  %vm626_vm9 = vsmask.f32 3328 }
  0x13   : > { %v432_v28 = vld [vmem:[#allocation2 + $0xc] sm:$0x1]  ;;  %v407_v29 = vsel %vm3264_vm3, 0, %v406_v27  ;;  %vm3271_vm4 = vmand %vm403_vm0, %vm430_vm2  ;;  %v3030_v31 = vld [vmem:[%s3840_s2 + $0x78] sm:$0xff]  ;;  %vm627_vm10 = vsmask.f32 7440 }
  0x14   : > { %362 = vmatpush.bf16.msra.mxu0 %v3008_v2  ;;  %3105 = vmatpush.bf16.msra.mxu3 %v3008_v2  ;;  %v3019_v32 = vld [vmem:[%s3840_s2 + $0x20] sm:$0xff]  ;;  %408 = vst [vmem:[#allocation2 + $0x8] sm:$0x1] %v407_v29  ;;  %v433_v33 = vsel %vm3271_vm4, 0, %v432_v28  ;;  %v3049_v34 = vld [vmem:[%s3840_s2 + $0xf0] sm:$0xff]  ;;  %v3036_v35 = vld [vmem:[%s3840_s2 + $0xa8] sm:$0xff] }
  0x15   : > { %434 = vst [vmem:[#allocation2 + $0xc] sm:$0x1] %v433_v33  ;;  %822 = vmatpush.bf16.msra.mxu1 %v3030_v31  ;;  %v3029_v36 = vld [vmem:[%s3840_s2 + $0x70] sm:$0xff]  ;;  %v3018_v37 = vld [vmem:[%s3840_s2 + $0x18] sm:$0xff]  ;;  %v3048_v38 = vld [vmem:[%s3840_s2 + $0xe8] sm:$0xff] }
  0x16   : > { %925 = vmatpush.bf16.msra.mxu2 %v3020_v23  ;;  %v3035_v39 = vld [vmem:[%s3840_s2 + $0xa0] sm:$0xff]  ;;  %v3028_v40 = vld [vmem:[%s3840_s2 + $0x68] sm:$0xff]  ;;  %v409_v41 = vld [vmem:[#allocation2 + $0x10] sm:$0x1] }
  0x17   : > { %v410_v42 = vsel %vm3264_vm3, 0, %v409_v41  ;;  %v435_v43 = vld [vmem:[#allocation2 + $0x14] sm:$0x1]  ;;  %v3047_v46 = vld [vmem:[%s3840_s2 + $0xe0] sm:$0xff]  ;;  %v3034_v47 = vld [vmem:[%s3840_s2 + $0x98] sm:$0xff] }
  0x18   : > { %363 = vmatpush.bf16.msra.mxu0 %v3007_v3  ;;  %3106 = vmatpush.bf16.msra.mxu3 %v3007_v3  ;;  %v3017_v44 = vld [vmem:[%s3840_s2 + $0x10] sm:$0xff]  ;;  %411 = vst [vmem:[#allocation2 + $0x10] sm:$0x1] %v410_v42  ;;  %v436_v45 = vsel %vm3271_vm4, 0, %v435_v43  ;;  %v3027_v48 = vld [vmem:[%s3840_s2 + $0x60] sm:$0xff]  ;;  %v3016_v50 = vld [vmem:[%s3840_s2 + $0x8] sm:$0xff] }
  0x19   : > { %823 = vmatpush.bf16.msra.mxu1 %v3029_v36  ;;  %437 = vst [vmem:[#allocation2 + $0x14] sm:$0x1] %v436_v45  ;;  %v3046_v51 = vld [vmem:[%s3840_s2 + $0xd8] sm:$0xff]  ;;  %v3033_v52 = vld [vmem:[%s3840_s2 + $0x90] sm:$0xff]  ;;  %v3015_v58 = vld [vmem:[%s3840_s2] sm:$0xff] }
  0x1a   : > { %926 = vmatpush.bf16.msra.mxu2 %v3019_v32  ;;  %v412_v53 = vld [vmem:[#allocation2 + $0x18] sm:$0x1]  ;;  %v438_v54 = vld [vmem:[#allocation2 + $0x1c] sm:$0x1]  ;;  %v3045_v59 = vld [vmem:[%s3840_s2 + $0xd0] sm:$0xff] }
  0x1b   : > { %v3026_v55 = vld [vmem:[%s3840_s2 + $0x58] sm:$0xff]  ;;  %v413_v56 = vsel %vm3264_vm3, 0, %v412_v53  ;;  %v439_v57 = vsel %vm3271_vm4, 0, %v438_v54  ;;  %v3032_v60 = vld [vmem:[%s3840_s2 + $0x88] sm:$0xff]  ;;  %v3025_v1 = vld [vmem:[%s3840_s2 + $0x50] sm:$0xff] }
  0x1c   : > { %364 = vmatpush.bf16.msra.mxu0 %v3006_v4  ;;  %3107 = vmatpush.bf16.msra.mxu3 %v3006_v4  ;;  %414 = vst [vmem:[#allocation2 + $0x18] sm:$0x1] %v413_v56  ;;  %v418_v61 = vld [vmem:[#allocation2 + $0x28] sm:$0x1]  ;;  %v444_v62 = vld [vmem:[#allocation2 + $0x2c] sm:$0x1]  ;;  %vm3397_vm8 = vmand %vm544_vm5, %vm430_vm2 }
  0x1d   : > { %824 = vmatpush.bf16.msra.mxu1 %v3028_v40  ;;  %440 = vst [vmem:[#allocation2 + $0x1c] sm:$0x1] %v439_v57  ;;  %v419_v63 = vsel %vm3264_vm3, 0, %v418_v61  ;;  %v445_v0 = vsel %vm3271_vm4, 0, %v444_v62  ;;  %v3044_v2 = vld [vmem:[%s3840_s2 + $0xc8] sm:$0xff]  ;;  %v3031_v3 = vld [vmem:[%s3840_s2 + $0x80] sm:$0xff]  ;;  %vm3420_vm11 = vmor %vm976_vm6, %vm977_vm7 }
  0x1e   : > { %927 = vmatpush.bf16.msra.mxu2 %v3018_v37  ;;  %420 = vst [vmem:[#allocation2 + $0x28] sm:$0x1] %v419_v63  ;;  %v3024_v4 = vld [vmem:[%s3840_s2 + $0x48] sm:$0xff]  ;;  %v3364_v5 = vld [vmem:[%s3842_s4] ss:$0 sm:$0xff]  ;;  %v3058_v41 = vld [vmem:[%s3840_s2 + $0x138] sm:$0xff] }
  0x1f   : > { %446 = vst [vmem:[#allocation2 + $0x2c] sm:$0x1] %v445_v0  ;;  %v441_v7 = vld [vmem:[#allocation2 + $0x24] sm:$0x1]  ;;  %v421_v12 = vld [vmem:[#allocation2 + $0x30] sm:$0x1]  ;;  %vm3439_vm12 = vmor %vm626_vm9, %vm627_vm10 }
  0x20   : > { %365 = vmatpush.bf16.msra.mxu0 %v3005_v6  ;;  %3108 = vmatpush.bf16.msra.mxu3 %v3005_v6  ;;  %v415_v6 = vld [vmem:[#allocation2 + $0x20] sm:$0x1]  ;;  %v447_v13 = vld [vmem:[#allocation2 + $0x34] sm:$0x1]  ;;  %v424_v18 = vld [vmem:[#allocation2 + $0x38] sm:$0x1] }
  0x21   : > { %825 = vmatpush.bf16.msra.mxu1 %v3027_v48  ;;  %v3043_v10 = vld [vmem:[%s3840_s2 + $0xc0] sm:$0xff]  ;;  %v546_v33 = vld [vmem:[#allocation2 + $0x8] sm:$0xf]  ;;  %v3086_v42 = vld [vmem:[%s3840_s2 + $0x1f8] sm:$0xff] }
  0x22   : > { %928 = vmatpush.bf16.msra.mxu2 %v3017_v44  ;;  %v594_v17 = vld [vmem:[#allocation2] sm:$0xf]  ;;  %v3386_v32 = vld [vmem:[#allocation2 + $0x4] sm:$0x1]  ;;  %v3053_v43 = vld [vmem:[%s3840_s2 + $0x110] sm:$0xff] }
  0x23   : > { %v3023_v19 = vld [vmem:[%s3840_s2 + $0x40] sm:$0xff]  ;;  %v630_v27 = vshrl.u32 %v594_v17, 16  ;;  %v633_v28 = vshll.u32 %v594_v17, 16  ;;  %v981_v44 = vrot.slane %v3386_v32, 5  ;;  %v639_v0 = vshll.u32 %v3386_v32, 16 }
  0x24   : > { %366 = vmatpush.bf16.msra.mxu0 %v3004_v8  ;;  %3109 = vmatpush.bf16.msra.mxu3 %v3004_v8  ;;  %v416_v8 = vsel %vm3264_vm3, 0, %v415_v6  ;;  %v952_v36 = vld [vmem:[#allocation2] sm:$0xe]  ;;  %v427_v53 = vld [vmem:[#allocation2 + $0x40] sm:$0x1] }
  0x25   : > { %826 = vmatpush.bf16.msra.mxu1 %v3026_v55  ;;  %417 = vst [vmem:[#allocation2 + $0x20] sm:$0x1] %v416_v8  ;;  %v632_v45 = vrot.slane %v630_v27, 4  ;;  %v2575_v54 = vrot.slane %v952_v36, 9  ;;  %v428_v55 = vsel %vm3264_vm3, 0, %v427_v53 }
  0x26   : > { %929 = vmatpush.bf16.msra.mxu2 %v3016_v50  ;;  %v453_v56 = vld [vmem:[#allocation2 + $0x44] sm:$0x1]  ;;  %429 = vst [vmem:[#allocation2 + $0x40] sm:$0x1] %v428_v55 }
  0x27   : > { %v3427_v17 = vsel %vm3420_vm11, %v2575_v54, %v981_v44 }
  0x28   : > { %367 = vmatpush.bf16.msra.mxu0 %v3003_v9  ;;  %3110 = vmatpush.bf16.msra.mxu3 %v3003_v9  ;;  %v442_v9 = vsel %vm3271_vm4, 0, %v441_v7 }
  0x29   : > { %827 = vmatpush.bf16.msra.mxu1 %v3025_v1  ;;  %443 = vst [vmem:[#allocation2 + $0x24] sm:$0x1] %v442_v9  ;;  %v454_v1 = vsel %vm3271_vm4, 0, %v453_v56  ;;  %v573_v9 = vld [vmem:[#allocation2 + $0x2c] sm:$0x1] }
  0x2a   : > { %930 = vmatpush.bf16.msra.mxu2 %v3015_v58  ;;  %455 = vst [vmem:[#allocation2 + $0x44] sm:$0x1] %v454_v1  ;;  %v3066_v1 = vld [vmem:[%s3840_s2 + $0x178] sm:$0xff] }
  0x2b   : > { %368 = vmatmul.bf16.vlgmr.msra.gmra.mxu0 %v288_v15  ;;  %378 = vmatmul.bf16.vlgmr.msra.gmra.mxu3 %v290_v16  ;;  %v422_v15 = vsel %vm3264_vm3, 0, %v421_v12  ;;  %v448_v16 = vsel %vm3271_vm4, 0, %v447_v13 }
  0x2c   : > { %1092 = vmatpush.bf16.msrb.mxu3 %v3038_v14  ;;  %1226 = vmatpush.bf16.msrb.mxu0 %v3050_v24  ;;  %423 = vst [vmem:[#allocation2 + $0x30] sm:$0x1] %v422_v15  ;;  %v555_v15 = vld [vmem:[#allocation2 + $0x14] sm:$0x1] }
  0x2d   : > { %828 = vmatpush.bf16.msra.mxu1 %v3024_v4  ;;  %449 = vst [vmem:[#allocation2 + $0x34] sm:$0x1] %v448_v16  ;;  %v570_v4 = vld [vmem:[#allocation2 + $0x28] sm:$0xf] }
  0x2e   : > { %1646 = vmatpush.bf16.msrb.mxu2 %v3066_v1 }
  0x30   : > { %1093 = vmatpush.bf16.msrb.mxu3 %v3037_v25  ;;  %1227 = vmatpush.bf16.msrb.mxu0 %v3049_v34  ;;  %v549_v34 = vld [vmem:[#allocation2 + $0xc] sm:$0x1] }
  0x31   : > { %829 = vmatpush.bf16.msra.mxu1 %v3023_v19  ;;  %v3431_v19 = vrot.slane %v639_v0, 5 }
  0x34   : > { %1094 = vmatpush.bf16.msrb.mxu3 %v3036_v35  ;;  %1228 = vmatpush.bf16.msrb.mxu0 %v3048_v38  ;;  %v579_v53 = vld [vmem:[#allocation2 + $0x34] sm:$0x1] }
  0x35   : > { %1472 = vmatpush.bf16.msrb.mxu1 %v3058_v41  ;;  %v576_v41 = vld [vmem:[#allocation2 + $0x30] sm:$0xf] }
  0x38   : > { %1095 = vmatpush.bf16.msrb.mxu3 %v3035_v39  ;;  %1229 = vmatpush.bf16.msrb.mxu0 %v3047_v46  ;;  %v635_v46 = vrot.slane %v633_v28, 5 }
  0x3a   : > { %v636_v63 = vor.u32 %v635_v46, %v632_v45 }
  0x3b   : > { %373 = vmatmul.bf16.gmra.mxu0 %v289_v21  ;;  %383 = vmatmul.bf16.gmra.mxu3 %v291_v22  ;;  %v425_v21 = vsel %vm3264_vm3, 0, %v424_v18  ;;  %v450_v22 = vld [vmem:[#allocation2 + $0x3c] sm:$0x1] }
  0x3c   : > { %1096 = vmatpush.bf16.msrb.mxu3 %v3034_v47  ;;  %1230 = vmatpush.bf16.msrb.mxu0 %v3046_v51  ;;  %426 = vst [vmem:[#allocation2 + $0x38] sm:$0x1] %v425_v21  ;;  %v451_v23 = vsel %vm3271_vm4, 0, %v450_v22  ;;  %v3057_v51 = vld [vmem:[%s3840_s2 + $0x130] sm:$0xff]  ;;  %v3429_v18 = vrot.slane %v636_v63, 4 }
  0x3d   : > { %452 = vst [vmem:[#allocation2 + $0x3c] sm:$0x1] %v451_v23  ;;  %1473 = vmatpush.bf16.msrb.mxu1 %v3057_v51 }
  0x3e   : > { %v642_v46 = vsel %vm3439_vm12, %v3429_v18, %v3431_v19 }
  0x40   : > { %1097 = vmatpush.bf16.msrb.mxu3 %v3033_v52  ;;  %1231 = vmatpush.bf16.msrb.mxu0 %v3045_v59  ;;  %v3085_v52 = vld [vmem:[%s3840_s2 + $0x1f0] sm:$0xff] }
  0x44   : > { %1098 = vmatpush.bf16.msrb.mxu3 %v3032_v60  ;;  %1232 = vmatpush.bf16.msrb.mxu0 %v3044_v2 }
  0x48   : > { %1099 = vmatpush.bf16.msrb.mxu3 %v3031_v3  ;;  %1233 = vmatpush.bf16.msrb.mxu0 %v3043_v10 }
  0x4c   : > { %2027 = vmatpush.bf16.msra.mxu0 %v3086_v42 }
  0x50   : > { %2028 = vmatpush.bf16.msra.mxu0 %v3085_v52 }
  0xa8   : > { %v369_v11 = vpop.f32.mrf.mxu0 }
  0xa9   : > { %v370_v14 = vadd.f32 %v3364_v5, %v369_v11  ;;  %v552_v11 = vld [vmem:[#allocation2 + $0x10] sm:$0xf] }
  0xab   : > { %v389_v20 = vmax.f32 %v370_v14, 0.0 }
  0xad   : > { %v456_v24 = vpack.c.bf16 %v389_v20, %v389_v20 }
  0xae   : > { %v379_v25 = vpop.f32.mrf.mxu3 }
  0xaf   : > { %v465_v29 = vshrl.u32 %v456_v24, 16  ;;  %v380_v31 = vadd.f32 %v3364_v5, %v379_v25  ;;  %v468_v38 = vshll.u32 %v456_v24, 16  ;;  %v2529_v24 = vld [vmem:[#allocation2] sm:$0xf] }
  0xb0   : > { %v371_v35 = vpop.f32.mrf.mxu0 }
  0xb1   : > { %v467_v37 = vrot.slane %v465_v29, 7  ;;  %v372_v39 = vadd.f32 %v3364_v5, %v371_v35  ;;  %v393_v40 = vmax.f32 %v380_v31, 0.0 }
  0xb3   : > { %v470_v47 = vor.u32 %v468_v38, %v467_v37  ;;  %v471_v48 = vrot.slane %v467_v37, 4  ;;  %v390_v49 = vmax.f32 %v372_v39, 0.0  ;;  %v460_v50 = vpack.c.bf16 %v393_v40, %v393_v40 }
  0xb5   : > { %v547_v57 = vsel %vm3397_vm8, %v470_v47, %v546_v33  ;;  %v550_v58 = vsel %vm3264_vm3, %v471_v48, %v549_v34  ;;  %v457_v59 = vpack.c.bf16 %v390_v49, %v390_v49  ;;  %v497_v60 = vshrl.u32 %v460_v50, 16 }
  0xb6   : > { %548 = vst [vmem:[#allocation2 + $0x8] sm:$0xf] %v547_v57  ;;  %v500_v61 = vshll.u32 %v460_v50, 16  ;;  %v381_v62 = vpop.f32.mrf.mxu3  ;;  %v1028_v34 = vunpack.c.l.b16 %v3427_v17 }
  0xb7   : > { %551 = vst [vmem:[#allocation2 + $0xc] sm:$0x1] %v550_v58  ;;  %v473_v2 = vshrl.u32 %v457_v59, 16  ;;  %v499_v3 = vrot.slane %v497_v60, 7  ;;  %v382_v6 = vadd.f32 %v3364_v5, %v381_v62  ;;  %v476_v8 = vshll.u32 %v457_v59, 16  ;;  %v3056_v58 = vld [vmem:[%s3840_s2 + $0x128] sm:$0xff] }
  0xb8   : > { %v374_v10 = vpop.f32.mrf.mxu0  ;;  %v3084_v59 = vld [vmem:[%s3840_s2 + $0x1e8] sm:$0xff]  ;;  %1474 = vmatpush.bf16.msrb.mxu1 %v3056_v58 }
  0xb9   : > { %v475_v30 = vrot.slane %v473_v2, 7  ;;  %v502_v12 = vor.u32 %v500_v61, %v499_v3  ;;  %v503_v13 = vrot.slane %v499_v3, 4  ;;  %v375_v14 = vadd.f32 %v3364_v5, %v374_v10  ;;  %v558_v61 = vld [vmem:[#allocation2 + $0x18] sm:$0xf]  ;;  %v561_v2 = vld [vmem:[#allocation2 + $0x1c] sm:$0x1]  ;;  %2029 = vmatpush.bf16.msra.mxu0 %v3084_v59 }
  0xba   : > { %v394_v16 = vmax.f32 %v382_v6, 0.0  ;;  %v3077_v59 = vld [vmem:[%s3840_s2 + $0x1b0] sm:$0xff] }
  0xbb   : > { %v478_v20 = vor.u32 %v476_v8, %v475_v30  ;;  %v479_v21 = vrot.slane %v475_v30, 4  ;;  %v571_v22 = vsel %vm3397_vm8, %v502_v12, %v570_v4  ;;  %v574_v23 = vsel %vm3264_vm3, %v503_v13, %v573_v9  ;;  %v3055_v9 = vld [vmem:[%s3840_s2 + $0x120] sm:$0xff] }
  0xbc   : > { %572 = vst [vmem:[#allocation2 + $0x28] sm:$0xf] %v571_v22  ;;  %v391_v25 = vmax.f32 %v375_v14, 0.0  ;;  %v461_v27 = vpack.c.bf16 %v394_v16, %v394_v16  ;;  %v3083_v14 = vld [vmem:[%s3840_s2 + $0x1e0] sm:$0xff]  ;;  %v582_v22 = vld [vmem:[#allocation2 + $0x38] sm:$0xf]  ;;  %1475 = vmatpush.bf16.msrb.mxu1 %v3055_v9 }
  0xbd   : > { %v553_v29 = vsel %vm3397_vm8, %v478_v20, %v552_v11  ;;  %v556_v31 = vsel %vm3264_vm3, %v479_v21, %v555_v15  ;;  %575 = vst [vmem:[#allocation2 + $0x2c] sm:$0x1] %v574_v23  ;;  %v3011_v32 = vld [vmem:[#allocation2 + $0x4] sm:$0xf0]  ;;  %v585_v23 = vld [vmem:[#allocation2 + $0x3c] sm:$0x1]  ;;  %2030 = vmatpush.bf16.msra.mxu0 %v3083_v14 }
  0xbe   : > { %v953_v33 = vld [vmem:[#allocation2 + $0x8] sm:$0xe]  ;;  %554 = vst [vmem:[#allocation2 + $0x10] sm:$0xf] %v553_v29  ;;  %v458_v35 = vpack.c.bf16 %v391_v25, %v391_v25  ;;  %v505_v36 = vshrl.u32 %v461_v27, 16  ;;  %v508_v37 = vshll.u32 %v461_v27, 16  ;;  %v2530_v38 = vor.u32 %v3011_v32, %v2529_v24  ;;  %v384_v39 = vpop.f32.mrf.mxu3 }
  0xbf   : > { %v619_v40 = vld [vmem:[#allocation2 + $0xc] sm:$0x1]  ;;  %557 = vst [vmem:[#allocation2 + $0x14] sm:$0x1] %v556_v31  ;;  %v385_v42 = vadd.f32 %v3364_v5, %v384_v39  ;;  %v2576_v44 = vrot.slane %v953_v33, 9 }
  0xc0   : > { %v985_v45 = vrot.slane %v619_v40, 5  ;;  %v481_v47 = vshrl.u32 %v458_v35, 16  ;;  %v484_v48 = vshll.u32 %v458_v35, 16  ;;  %v507_v49 = vrot.slane %v505_v36, 7  ;;  %v376_v50 = vpop.f32.mrf.mxu0  ;;  %931 = vmatmul.bf16.vlgmr.msra.gmra.mxu2 %v2530_v38  ;;  %v595_v51 = vld [vmem:[#allocation2 + $0x8] sm:$0xf] }
  0xc1   : > { %v653_v52 = vshll.u32 %v619_v40, 16  ;;  %v377_v54 = vadd.f32 %v3364_v5, %v376_v50  ;;  %v395_v55 = vmax.f32 %v385_v42, 0.0  ;;  %v644_v57 = vshrl.u32 %v595_v51, 16  ;;  %v2649_v13 = vld [vmem:[#allocation2 + $0x8] sm:$0xf] }
  0xc2   : > { %v986_v56 = vsel %vm3420_vm11, %v2576_v44, %v985_v45  ;;  %v483_v60 = vrot.slane %v481_v47, 7  ;;  %v510_v62 = vor.u32 %v508_v37, %v507_v49  ;;  %v511_v63 = vrot.slane %v507_v49, 4  ;;  %v567_v35 = vld [vmem:[#allocation2 + $0x24] sm:$0x1] }
  0xc3   : > { %v1029_v0 = vunpack.c.l.b16 %v986_v56  ;;  %v392_v3 = vmax.f32 %v377_v54, 0.0  ;;  %v462_v4 = vpack.c.bf16 %v395_v55, %v395_v55  ;;  %v646_v6 = vrot.slane %v644_v57, 4  ;;  %v3064_v56 = vld [vmem:[%s3840_s2 + $0x168] sm:$0xff] }
  0xc4   : > { %v647_v8 = vshll.u32 %v595_v51, 16  ;;  %v486_v10 = vor.u32 %v484_v48, %v483_v60  ;;  %v487_v30 = vrot.slane %v483_v60, 4  ;;  %v577_v11 = vsel %vm3397_vm8, %v510_v62, %v576_v41  ;;  %v3065_v48 = vld [vmem:[%s3840_s2 + $0x170] sm:$0xff] }
  0xc5   : > { %v580_v12 = vsel %vm3264_vm3, %v511_v63, %v579_v53  ;;  %578 = vst [vmem:[#allocation2 + $0x30] sm:$0xf] %v577_v11  ;;  %v459_v15 = vpack.c.bf16 %v392_v3, %v392_v3  ;;  %v513_v16 = vshrl.u32 %v462_v4, 16  ;;  %v516_v17 = vshll.u32 %v462_v4, 16  ;;  %v3039_v19 = vld [vmem:[#allocation2 + $0xc] sm:$0xf0]  ;;  %1647 = vmatpush.bf16.msrb.mxu2 %v3065_v48 }
  0xc6   : > { %v1036_v18 = vpack.c.b16 %v1029_v0, %v1028_v34  ;;  %v559_v20 = vsel %vm3397_vm8, %v486_v10, %v558_v61  ;;  %v562_v21 = vsel %vm3264_vm3, %v487_v30, %v561_v2  ;;  %581 = vst [vmem:[#allocation2 + $0x34] sm:$0x1] %v580_v12  ;;  %v2650_v24 = vor.u32 %v3039_v19, %v2649_v13  ;;  %v386_v27 = vpop.f32.mrf.mxu3  ;;  %v564_v34 = vld [vmem:[#allocation2 + $0x20] sm:$0xf]  ;;  %v3480_v39 = vld [vmem:[#allocation2 + $0x14] sm:$0x1] }
  0xc7   : > { %v649_v25 = vrot.slane %v647_v8, 5  ;;  %560 = vst [vmem:[#allocation2 + $0x18] sm:$0xf] %v559_v20  ;;  %v489_v29 = vshrl.u32 %v459_v15, 16  ;;  %v492_v31 = vshll.u32 %v459_v15, 16  ;;  %v515_v32 = vrot.slane %v513_v16, 7 }
  0xc8   : > { %1100 = vmatmul.bf16.vlgmr.msrb.gmra.mxu3 %v1036_v18  ;;  %v655_v33 = vrot.slane %v653_v52, 5  ;;  %563 = vst [vmem:[#allocation2 + $0x1c] sm:$0x1] %v562_v21  ;;  %1234 = vmatmul.bf16.vlgmr.msrb.gmra.mxu0 %v2650_v24  ;;  %v758_v37 = vunpack.c.l.b16 %v642_v46  ;;  %v387_v38 = vadd.f32 %v3364_v5, %v386_v27  ;;  %v954_v40 = vld [vmem:[#allocation2 + $0x10] sm:$0xe]  ;;  %v989_v51 = vrot.slane %v3480_v39, 5 }
  0xc9   : > { %v650_v36 = vor.u32 %v649_v25, %v646_v6  ;;  %v491_v41 = vrot.slane %v489_v29, 7  ;;  %v518_v42 = vor.u32 %v516_v17, %v515_v32  ;;  %v519_v44 = vrot.slane %v515_v32, 4  ;;  %v596_v47 = vld [vmem:[#allocation2 + $0x10] sm:$0xf]  ;;  %v3078_v5 = vld [vmem:[%s3840_s2 + $0x1b8] sm:$0xff]  ;;  %1648 = vmatpush.bf16.msrb.mxu2 %v3064_v56  ;;  %v3063_v24 = vld [vmem:[%s3840_s2 + $0x160] sm:$0xff] }
  0xca   : > { %v2577_v45 = vrot.slane %v954_v40, 9  ;;  %v396_v50 = vmax.f32 %v387_v38, 0.0  ;;  %v658_v46 = vshrl.u32 %v596_v47, 16  ;;  %1781 = vmatpush.bf16.msra.mxu3 %v3078_v5  ;;  %v2533_v63 = vld [vmem:[#allocation2 + $0x10] sm:$0xf]  ;;  %v661_v14 = vshll.u32 %v596_v47, 16 }
  0xcb   : > { %v651_v49 = vrot.slane %v650_v36, 4  ;;  %v494_v52 = vor.u32 %v492_v31, %v491_v41  ;;  %v495_v53 = vrot.slane %v491_v41, 4  ;;  %v583_v54 = vsel %vm3397_vm8, %v518_v42, %v582_v22  ;;  %v588_v11 = vld [vmem:[#allocation2 + $0x40] sm:$0xf]  ;;  %v591_v15 = vld [vmem:[#allocation2 + $0x44] sm:$0x1] }
  0xcc   : > { %v586_v55 = vsel %vm3264_vm3, %v519_v44, %v585_v23  ;;  %584 = vst [vmem:[#allocation2 + $0x38] sm:$0xf] %v583_v54  ;;  %v463_v58 = vpack.c.bf16 %v396_v50, %v396_v50  ;;  %v660_v0 = vrot.slane %v658_v46, 4  ;;  %v990_v10 = vsel %vm3420_vm11, %v2577_v45, %v989_v51  ;;  %v3054_v22 = vld [vmem:[%s3840_s2 + $0x118] sm:$0xff]  ;;  %v3075_v40 = vld [vmem:[%s3840_s2 + $0x1a0] sm:$0xff]  ;;  %v3081_v56 = vld [vmem:[%s3840_s2 + $0x1d0] sm:$0xff] }
  0xcd   : > { %v656_v57 = vsel %vm3439_vm12, %v651_v49, %v655_v33  ;;  %v565_v60 = vsel %vm3397_vm8, %v494_v52, %v564_v34  ;;  %v568_v61 = vsel %vm3264_vm3, %v495_v53, %v567_v35  ;;  %587 = vst [vmem:[#allocation2 + $0x3c] sm:$0x1] %v586_v55  ;;  %v667_v17 = vshll.u32 %v3480_v39, 16  ;;  %v3082_v23 = vld [vmem:[%s3840_s2 + $0x1d8] sm:$0xff]  ;;  %v599_v33 = vld [vmem:[#allocation2 + $0x28] sm:$0xf]  ;;  %1476 = vmatpush.bf16.msrb.mxu1 %v3054_v22 }
  0xce   : > { %v759_v62 = vunpack.c.l.b16 %v656_v57  ;;  %566 = vst [vmem:[#allocation2 + $0x20] sm:$0xf] %v565_v60  ;;  %v3012_v1 = vld [vmem:[#allocation2 + $0x14] sm:$0xf0]  ;;  %v521_v2 = vshrl.u32 %v463_v58, 16  ;;  %v524_v3 = vshll.u32 %v463_v58, 16  ;;  %1782 = vmatpush.bf16.msra.mxu3 %v3077_v59  ;;  %v1030_v25 = vunpack.c.l.b16 %v990_v10  ;;  %2031 = vmatpush.bf16.msra.mxu0 %v3082_v23 }
  0xcf   : > { %569 = vst [vmem:[#allocation2 + $0x24] sm:$0x1] %v568_v61  ;;  %v2534_v6 = vor.u32 %v3012_v1, %v2533_v63  ;;  %v3505_v8 = vld [vmem:[#allocation2 + $0x1c] sm:$0x1]  ;;  %v955_v9 = vld [vmem:[#allocation2 + $0x18] sm:$0xe]  ;;  %1649 = vmatpush.bf16.msrb.mxu2 %v3063_v24 }
  0xd0   : > { %v766_v4 = vpack.c.b16 %v759_v62, %v758_v37  ;;  %v523_v30 = vrot.slane %v521_v2, 7  ;;  %v2578_v12 = vrot.slane %v955_v9, 9  ;;  %v993_v13 = vrot.slane %v3505_v8, 5  ;;  %v597_v16 = vld [vmem:[#allocation2 + $0x18] sm:$0xf]  ;;  %v3076_v34 = vld [vmem:[%s3840_s2 + $0x1a8] sm:$0xff] }
  0xd1   : > { %936 = vmatmul.bf16.gmra.mxu2 %v2534_v6  ;;  %v663_v21 = vrot.slane %v661_v14, 5  ;;  %v2653_v29 = vld [vmem:[#allocation2 + $0x18] sm:$0xf]  ;;  %v672_v31 = vshrl.u32 %v597_v16, 16  ;;  %v675_v32 = vshll.u32 %v597_v16, 16  ;;  %v681_v38 = vshll.u32 %v3505_v8, 16  ;;  %1477 = vmatpush.bf16.msrb.mxu1 %v3053_v43 }
  0xd2   : > { %830 = vmatmul.bf16.vlgmr.msra.gmra.mxu1 %v766_v4  ;;  %v526_v18 = vor.u32 %v524_v3, %v523_v30  ;;  %v527_v19 = vrot.slane %v523_v30, 4  ;;  %v994_v20 = vsel %vm3420_vm11, %v2578_v12, %v993_v13  ;;  %v3062_v39 = vld [vmem:[%s3840_s2 + $0x158] sm:$0xff]  ;;  %v3539_v45 = vld [vmem:[#allocation2 + $0x2c] sm:$0x1]  ;;  %1783 = vmatpush.bf16.msra.mxu3 %v3076_v34  ;;  %v669_v49 = vrot.slane %v667_v17, 5  ;;  %v3061_v61 = vld [vmem:[%s3840_s2 + $0x150] sm:$0xff] }
  0xd3   : > { %v1031_v27 = vunpack.c.l.b16 %v994_v20  ;;  %v664_v37 = vor.u32 %v663_v21, %v660_v0  ;;  %v674_v42 = vrot.slane %v672_v31, 4  ;;  %v677_v44 = vrot.slane %v675_v32, 5  ;;  %v957_v50 = vld [vmem:[#allocation2 + $0x28] sm:$0xe]  ;;  %1650 = vmatpush.bf16.msrb.mxu2 %v3062_v39  ;;  %2032 = vmatpush.bf16.msra.mxu0 %v3081_v56  ;;  %v3074_v2 = vld [vmem:[%s3840_s2 + $0x198] sm:$0xff]  ;;  %v3073_v17 = vld [vmem:[%s3840_s2 + $0x190] sm:$0xff] }
  0xd4   : > { %v589_v35 = vsel %vm3397_vm8, %v526_v18, %v588_v11  ;;  %v592_v36 = vsel %vm3264_vm3, %v527_v19, %v591_v15  ;;  %v700_v55 = vshrl.u32 %v599_v33, 16  ;;  %v683_v58 = vrot.slane %v681_v38, 5  ;;  %v3013_v6 = vld [vmem:[#allocation2 + $0x24] sm:$0xf0]  ;;  %v3059_v31 = vld [vmem:[%s3840_s2 + $0x140] sm:$0xff] }
  0xd5   : > { %590 = vst [vmem:[#allocation2 + $0x40] sm:$0xf] %v589_v35  ;;  %v1037_v26 = vpack.c.b16 %v1031_v27, %v1030_v25  ;;  %v3040_v41 = vld [vmem:[#allocation2 + $0x1c] sm:$0xf0]  ;;  %v665_v48 = vrot.slane %v664_v37, 4  ;;  %v678_v51 = vor.u32 %v677_v44, %v674_v42  ;;  %v2580_v59 = vrot.slane %v957_v50, 9 }
  0xd6   : > { %593 = vst [vmem:[#allocation2 + $0x44] sm:$0x1] %v592_v36  ;;  %v2654_v47 = vor.u32 %v3040_v41, %v2653_v29  ;;  %v3541_v46 = vld [vmem:[#allocation2 + $0x24] sm:$0x1]  ;;  %v956_v5 = vld [vmem:[#allocation2 + $0x20] sm:$0xe]  ;;  %1784 = vmatpush.bf16.msra.mxu3 %v3075_v40 }
  0xd7   : > { %v598_v52 = vld [vmem:[#allocation2 + $0x20] sm:$0xf]  ;;  %v670_v53 = vsel %vm3439_vm12, %v665_v48, %v669_v49  ;;  %v679_v57 = vrot.slane %v678_v51, 4  ;;  %v2579_v62 = vrot.slane %v956_v5, 9  ;;  %v997_v63 = vrot.slane %v3541_v46, 5  ;;  %1651 = vmatpush.bf16.msrb.mxu2 %v3061_v61  ;;  %v3060_v16 = vld [vmem:[%s3840_s2 + $0x148] sm:$0xff] }
  0xd8   : > { %1105 = vmatmul.bf16.gmra.mxu3 %v1037_v26  ;;  %1239 = vmatmul.bf16.gmra.mxu0 %v2654_v47  ;;  %v686_v54 = vshrl.u32 %v598_v52, 16  ;;  %v689_v60 = vshll.u32 %v598_v52, 16  ;;  %v1001_v0 = vrot.slane %v3539_v45, 5  ;;  %v703_v1 = vshll.u32 %v599_v33, 16  ;;  %v2537_v10 = vld [vmem:[#allocation2 + $0x20] sm:$0xf] }
  0xd9   : > { %v684_v3 = vsel %vm3439_vm12, %v679_v57, %v683_v58  ;;  %v760_v4 = vunpack.c.l.b16 %v670_v53  ;;  %v702_v11 = vrot.slane %v700_v55, 4  ;;  %v998_v14 = vsel %vm3420_vm11, %v2579_v62, %v997_v63  ;;  %v3052_v24 = vld [vmem:[%s3840_s2 + $0x108] sm:$0xff]  ;;  %v3041_v33 = vld [vmem:[#allocation2 + $0x2c] sm:$0xf0]  ;;  %v3051_v35 = vld [vmem:[%s3840_s2 + $0x100] sm:$0xff] }
  0xda   : > { %v688_v8 = vrot.slane %v686_v54, 4  ;;  %v761_v9 = vunpack.c.l.b16 %v684_v3  ;;  %v691_v30 = vrot.slane %v689_v60, 5  ;;  %v705_v12 = vrot.slane %v703_v1, 5  ;;  %1785 = vmatpush.bf16.msra.mxu3 %v3074_v2  ;;  %v3080_v25 = vld [vmem:[%s3840_s2 + $0x1c8] sm:$0xff]  ;;  %v600_v34 = vld [vmem:[#allocation2 + $0x30] sm:$0xf]  ;;  %1478 = vmatpush.bf16.msrb.mxu1 %v3052_v24 }
  0xdb   : > { %v1002_v15 = vsel %vm3420_vm11, %v2580_v59, %v1001_v0  ;;  %v2538_v18 = vor.u32 %v3013_v6, %v2537_v10  ;;  %v709_v21 = vshll.u32 %v3539_v45, 16  ;;  %v1032_v22 = vunpack.c.l.b16 %v998_v14  ;;  %v2657_v27 = vld [vmem:[#allocation2 + $0x28] sm:$0xf]  ;;  %1652 = vmatpush.bf16.msrb.mxu2 %v3060_v16  ;;  %2033 = vmatpush.bf16.msra.mxu0 %v3080_v25  ;;  %v624_v40 = vld [vmem:[#allocation2 + $0x34] sm:$0x1]  ;;  %v3079_v26 = vld [vmem:[%s3840_s2 + $0x1c0] sm:$0xff] }
  0xdc   : > { %v767_v13 = vpack.c.b16 %v761_v9, %v760_v4  ;;  %v692_v19 = vor.u32 %v691_v30, %v688_v8  ;;  %v706_v20 = vor.u32 %v705_v12, %v702_v11  ;;  %v1033_v23 = vunpack.c.l.b16 %v1002_v15  ;;  %v3072_v32 = vld [vmem:[%s3840_s2 + $0x188] sm:$0xff]  ;;  %v601_v43 = vld [vmem:[#allocation2 + $0x38] sm:$0xf]  ;;  %v958_v44 = vld [vmem:[#allocation2 + $0x30] sm:$0xe] }
  0xdd   : > { %v695_v29 = vshll.u32 %v3541_v46, 16  ;;  %v711_v38 = vrot.slane %v709_v21, 5  ;;  %v2658_v41 = vor.u32 %v3041_v33, %v2657_v27  ;;  %v714_v45 = vshrl.u32 %v600_v34, 16  ;;  %v3071_v48 = vld [vmem:[%s3840_s2 + $0x180] sm:$0xff]  ;;  %v625_v49 = vld [vmem:[#allocation2 + $0x3c] sm:$0x1] }
  0xde   : > { %1786 = vmatpush.bf16.msra.mxu3 %v3073_v17  ;;  %v693_v36 = vrot.slane %v692_v19, 4  ;;  %v707_v37 = vrot.slane %v706_v20, 4  ;;  %v1038_v39 = vpack.c.b16 %v1033_v23, %v1032_v22  ;;  %v717_v47 = vshll.u32 %v600_v34, 16  ;;  %v959_v50 = vld [vmem:[#allocation2 + $0x38] sm:$0xe]  ;;  %1479 = vmatpush.bf16.msrb.mxu1 %v3051_v35  ;;  %v3093_v34 = vld [vmem:[%s3840_s2 + $0x230] sm:$0xff] }
  0xdf   : > { %v697_v42 = vrot.slane %v695_v29, 5  ;;  %1653 = vmatpush.bf16.msrb.mxu2 %v3059_v31  ;;  %v728_v5 = vshrl.u32 %v601_v43, 16  ;;  %v731_v52 = vshll.u32 %v601_v43, 16  ;;  %v2581_v53 = vrot.slane %v958_v44, 9  ;;  %2034 = vmatpush.bf16.msra.mxu0 %v3079_v26  ;;  %v2541_v61 = vld [vmem:[#allocation2 + $0x30] sm:$0xf] }
  0xe0   : > { %v712_v46 = vsel %vm3439_vm12, %v707_v37, %v711_v38  ;;  %v1005_v54 = vrot.slane %v624_v40, 5  ;;  %v2582_v55 = vrot.slane %v959_v50, 9  ;;  %v1009_v56 = vrot.slane %v625_v49, 5  ;;  %v3014_v62 = vld [vmem:[#allocation2 + $0x34] sm:$0xf0] }
  0xe1   : > { %941 = vmatmul.bf16.gmra.mxu2 %v2538_v18  ;;  %v698_v51 = vsel %vm3439_vm12, %v693_v36, %v697_v42  ;;  %v716_v57 = vrot.slane %v714_v45, 4  ;;  %v719_v58 = vrot.slane %v717_v47, 5  ;;  %v763_v60 = vunpack.c.l.b16 %v712_v46  ;;  %v1820_v1 = vld [vmem:[#allocation2 + $0x18] sm:$0xf]  ;;  %v1818_v2 = vld [vmem:[#allocation2 + $0x10] sm:$0xf] }
  0xe2   : > { %835 = vmatmul.bf16.gmra.mxu1 %v767_v13  ;;  %1787 = vmatpush.bf16.msra.mxu3 %v3072_v32  ;;  %v762_v59 = vunpack.c.l.b16 %v698_v51  ;;  %v730_v63 = vrot.slane %v728_v5, 4  ;;  %v733_v0 = vrot.slane %v731_v52, 5  ;;  %v1006_v3 = vsel %vm3420_vm11, %v2581_v53, %v1005_v54  ;;  %v3599_v30 = vld [vmem:[#allocation2 + $0x14] sm:$0x1]  ;;  %v1510_v15 = vld [vmem:[#allocation2 + $0x10] sm:$0xe] }
  0xe3   : > { %v1010_v4 = vsel %vm3420_vm11, %v2582_v55, %v1009_v56  ;;  %v720_v6 = vor.u32 %v719_v58, %v716_v57  ;;  %v723_v8 = vshll.u32 %v624_v40, 16  ;;  %v2542_v10 = vor.u32 %v3014_v62, %v2541_v61  ;;  %v2661_v20 = vld [vmem:[#allocation2 + $0x38] sm:$0xf]  ;;  %v3042_v21 = vld [vmem:[#allocation2 + $0x3c] sm:$0xf0] }
  0xe4   : > { %v768_v9 = vpack.c.b16 %v763_v60, %v762_v59  ;;  %v1849_v11 = vshrl.u32 %v1820_v1, 16  ;;  %v1852_v12 = vshll.u32 %v1820_v1, 16  ;;  %v734_v13 = vor.u32 %v733_v0, %v730_v63  ;;  %v3094_v22 = vld [vmem:[%s3840_s2 + $0x238] sm:$0xff]  ;;  %v3604_v25 = vld [vmem:[#allocation2 + $0xc] sm:$0x1] }
  0xe5   : > { %v737_v14 = vshll.u32 %v625_v49, 16  ;;  %v1835_v16 = vshrl.u32 %v1818_v2, 16  ;;  %v1838_v17 = vshll.u32 %v1818_v2, 16  ;;  %v1034_v18 = vunpack.c.l.b16 %v1006_v3  ;;  %v1509_v27 = vld [vmem:[#allocation2 + $0x8] sm:$0xe]  ;;  %2201 = vmatpush.bf16.msrb.mxu0 %v3094_v22  ;;  %3111 = vmatpush.bf16.msra.mxu1 %v3094_v22 }
  0xe6   : > { %1788 = vmatpush.bf16.msra.mxu3 %v3071_v48  ;;  %v1035_v19 = vunpack.c.l.b16 %v1010_v4  ;;  %v721_v23 = vrot.slane %v720_v6, 4  ;;  %v725_v24 = vrot.slane %v723_v8, 5  ;;  %v2744_v29 = vrot.slane %v1510_v15, 9  ;;  %v3613_v45 = vld [vmem:[#allocation2 + $0x1c] sm:$0x1] }
  0xe7   : > { %v1539_v31 = vrot.slane %v3599_v30, 5  ;;  %v1851_v32 = vrot.slane %v1849_v11, 4  ;;  %v1854_v33 = vrot.slane %v1852_v12, 5  ;;  %v735_v35 = vrot.slane %v734_v13, 4  ;;  %v3617_v48 = vld [vmem:[#allocation2 + $0x14] sm:$0x1] }
  0xe8   : > { %1110 = vmatmul.bf16.gmra.mxu3 %v1038_v39  ;;  %1244 = vmatmul.bf16.gmra.mxu0 %v2658_v41  ;;  %v739_v36 = vrot.slane %v737_v14, 5  ;;  %v1837_v37 = vrot.slane %v1835_v16, 4  ;;  %v1840_v38 = vrot.slane %v1838_v17, 5  ;;  %v1265_v39 = vld [vmem:[#allocation2 + $0x10] sm:$0xf]  ;;  %v1039_v40 = vpack.c.b16 %v1035_v19, %v1034_v18 }
  0xe9   : > { %v2743_v43 = vrot.slane %v1509_v27, 9  ;;  %v1535_v26 = vrot.slane %v3604_v25, 5  ;;  %v1263_v41 = vld [vmem:[#allocation2 + $0x8] sm:$0xf]  ;;  %v2662_v42 = vor.u32 %v3042_v21, %v2661_v20  ;;  %v726_v44 = vsel %vm3439_vm12, %v721_v23, %v725_v24  ;;  %2202 = vmatpush.bf16.msrb.mxu0 %v3093_v34  ;;  %3112 = vmatpush.bf16.msra.mxu1 %v3093_v34  ;;  %v1822_v59 = vld [vmem:[#allocation2 + $0x20] sm:$0xf] }
  0xea   : > { %v1540_v47 = vsel %vm3420_vm11, %v2744_v29, %v1539_v31  ;;  %v1855_v49 = vor.u32 %v1854_v33, %v1851_v32  ;;  %v1294_v50 = vshrl.u32 %v1265_v39, 16  ;;  %v1297_v51 = vshll.u32 %v1265_v39, 16  ;;  %v1824_v0 = vld [vmem:[#allocation2 + $0x28] sm:$0xf]  ;;  %v3625_v6 = vld [vmem:[#allocation2 + $0x24] sm:$0x1] }
  0xeb   : > { %v740_v46 = vsel %vm3439_vm12, %v735_v35, %v739_v36  ;;  %v1841_v5 = vor.u32 %v1840_v38, %v1837_v37  ;;  %v1280_v52 = vshrl.u32 %v1263_v41, 16  ;;  %v1283_v53 = vshll.u32 %v1263_v41, 16  ;;  %v1512_v14 = vld [vmem:[#allocation2 + $0x20] sm:$0xe]  ;;  %v3630_v21 = vld [vmem:[#allocation2 + $0x1c] sm:$0x1] }
  0xec   : > { %v1536_v54 = vsel %vm3420_vm11, %v2743_v43, %v1535_v26  ;;  %v1858_v55 = vshll.u32 %v3613_v45, 16  ;;  %v764_v56 = vunpack.c.l.b16 %v726_v44  ;;  %v1583_v57 = vunpack.c.l.b16 %v1540_v47  ;;  %v2817_v22 = vld [vmem:[#allocation2 + $0x10] sm:$0xf]  ;;  %v3067_v23 = vld [vmem:[#allocation2 + $0x14] sm:$0xf0]  ;;  %v3091_v41 = vld [vmem:[%s3840_s2 + $0x220] sm:$0xff] }
  0xed   : > { %v1844_v58 = vshll.u32 %v3617_v48, 16  ;;  %v765_v60 = vunpack.c.l.b16 %v740_v46  ;;  %v1856_v61 = vrot.slane %v1855_v49, 4  ;;  %v1296_v62 = vrot.slane %v1294_v50, 4  ;;  %v3640_v26 = vld [vmem:[#allocation2 + $0x24] sm:$0x1] }
  0xee   : > { %v1299_v63 = vrot.slane %v1297_v51, 5  ;;  %v1582_v1 = vunpack.c.l.b16 %v1536_v54  ;;  %v1842_v2 = vrot.slane %v1841_v5, 4  ;;  %v1282_v3 = vrot.slane %v1280_v52, 4  ;;  %v1267_v50 = vld [vmem:[#allocation2 + $0x18] sm:$0xf] }
  0xef   : > { %v1285_v4 = vrot.slane %v1283_v53, 5  ;;  %v1860_v8 = vrot.slane %v1858_v55, 5  ;;  %v1866_v11 = vshll.u32 %v1822_v59, 16  ;;  %v1846_v13 = vrot.slane %v1844_v58, 5  ;;  %v3647_v46 = vld [vmem:[#allocation2 + $0x2c] sm:$0x1] }
  0xf0   : > { %v1590_v12 = vpack.c.b16 %v1583_v57, %v1582_v1  ;;  %v1877_v15 = vshrl.u32 %v1824_v0, 16  ;;  %v1880_v16 = vshll.u32 %v1824_v0, 16  ;;  %v769_v17 = vpack.c.b16 %v765_v60, %v764_v56 }
  0xf1   : > { %946 = vmatmul.bf16.gmra.mxu2 %v2542_v10  ;;  %v1863_v10 = vshrl.u32 %v1822_v59, 16  ;;  %v1861_v18 = vsel %vm3439_vm12, %v1856_v61, %v1860_v8  ;;  %v1289_v19 = vshll.u32 %v3604_v25, 16  ;;  %v1300_v20 = vor.u32 %v1299_v63, %v1296_v62  ;;  %v3092_v25 = vld [vmem:[%s3840_s2 + $0x228] sm:$0xff] }
  0xf2   : > { %840 = vmatmul.bf16.gmra.mxu1 %v768_v9  ;;  %v1511_v9 = vld [vmem:[#allocation2 + $0x18] sm:$0xe]  ;;  %v1847_v24 = vsel %vm3439_vm12, %v1842_v2, %v1846_v13  ;;  %v1286_v27 = vor.u32 %v1285_v4, %v1282_v3  ;;  %v1303_v29 = vshll.u32 %v3599_v30, 16  ;;  %v2746_v32 = vrot.slane %v1512_v14, 9  ;;  %2203 = vmatpush.bf16.msrb.mxu0 %v3092_v25 }
  0xf3   : > { %v2745_v31 = vrot.slane %v1511_v9, 9  ;;  %v1547_v33 = vrot.slane %v3625_v6, 5  ;;  %v1865_v34 = vrot.slane %v1863_v10, 4  ;;  %v1868_v35 = vrot.slane %v1866_v11, 5  ;;  %3113 = vmatpush.bf16.msra.mxu1 %v3092_v25  ;;  %v1826_v10 = vld [vmem:[#allocation2 + $0x30] sm:$0xf] }
  0xf4   : > { %v1964_v36 = vunpack.c.l.b16 %v1861_v18  ;;  %v1543_v37 = vrot.slane %v3630_v21, 5  ;;  %v1879_v38 = vrot.slane %v1877_v15, 4  ;;  %v1882_v39 = vrot.slane %v1880_v16, 5  ;;  %v1828_v14 = vld [vmem:[#allocation2 + $0x38] sm:$0xf] }
  0xf5   : > { %v2818_v43 = vor.u32 %v3067_v23, %v2817_v22  ;;  %v1301_v30 = vrot.slane %v1300_v20, 4  ;;  %v1287_v44 = vrot.slane %v1286_v27, 4  ;;  %v1291_v47 = vrot.slane %v1289_v19, 5  ;;  %v1513_v18 = vld [vmem:[#allocation2 + $0x28] sm:$0xe] }
  0xf6   : > { %v1305_v49 = vrot.slane %v1303_v29, 5  ;;  %v1548_v51 = vsel %vm3420_vm11, %v2746_v32, %v1547_v33  ;;  %v1869_v5 = vor.u32 %v1868_v35, %v1865_v34  ;;  %v1544_v55 = vsel %vm3420_vm11, %v2745_v31, %v1543_v37  ;;  %2204 = vmatpush.bf16.msrb.mxu0 %v3091_v41  ;;  %v3661_v22 = vld [vmem:[#allocation2 + $0x34] sm:$0x1]  ;;  %v1514_v23 = vld [vmem:[#allocation2 + $0x30] sm:$0xe] }
  0xf7   : > { %v1883_v56 = vor.u32 %v1882_v39, %v1879_v38  ;;  %v1886_v57 = vshll.u32 %v3647_v46, 16  ;;  %v1872_v59 = vshll.u32 %v3640_v26, 16  ;;  %v1308_v60 = vshrl.u32 %v1267_v50, 16  ;;  %3114 = vmatpush.bf16.msra.mxu1 %v3091_v41  ;;  %v2821_v34 = vld [vmem:[#allocation2 + $0x20] sm:$0xf] }
  0xf8   : > { %1115 = vmatmul.bf16.gmra.mxu3 %v1039_v40  ;;  %1249 = vmatmul.bf16.gmra.mxu0 %v2662_v42  ;;  %v1269_v40 = vld [vmem:[#allocation2 + $0x20] sm:$0xf]  ;;  %v1963_v42 = vunpack.c.l.b16 %v1847_v24  ;;  %v1306_v58 = vsel %vm3439_vm12, %v1301_v30, %v1305_v49  ;;  %v1311_v61 = vshll.u32 %v1267_v50, 16  ;;  %v1585_v62 = vunpack.c.l.b16 %v1548_v51  ;;  %v3068_v38 = vld [vmem:[#allocation2 + $0x24] sm:$0xf0] }
  0xf9   : > { %v1322_v52 = vshrl.u32 %v1269_v40, 16  ;;  %v1325_v53 = vshll.u32 %v1269_v40, 16  ;;  %v1292_v63 = vsel %vm3439_vm12, %v1287_v44, %v1291_v47  ;;  %v1870_v0 = vrot.slane %v1869_v5, 4  ;;  %v1271_v49 = vld [vmem:[#allocation2 + $0x28] sm:$0xf] }
  0xfa   : > { %v1971_v54 = vpack.c.b16 %v1964_v36, %v1963_v42  ;;  %v1409_v3 = vunpack.c.l.b16 %v1306_v58  ;;  %v1584_v4 = vunpack.c.l.b16 %v1544_v55  ;;  %v1884_v8 = vrot.slane %v1883_v56, 4  ;;  %v3672_v50 = vld [vmem:[#allocation2 + $0x34] sm:$0x1]  ;;  %v3674_v51 = vld [vmem:[#allocation2 + $0x3c] sm:$0x1] }
  0xfb   : > { %v1324_v1 = vrot.slane %v1322_v52, 4  ;;  %v1327_v2 = vrot.slane %v1325_v53, 5  ;;  %v1888_v9 = vrot.slane %v1886_v57, 5  ;;  %v1874_v11 = vrot.slane %v1872_v59, 5  ;;  %v1273_v56 = vld [vmem:[#allocation2 + $0x30] sm:$0xf] }
  0xfc   : > { %v1313_v13 = vrot.slane %v1311_v61, 5  ;;  %v1408_v15 = vunpack.c.l.b16 %v1292_v63  ;;  %v1591_v16 = vpack.c.b16 %v1585_v62, %v1584_v4  ;;  %v1891_v24 = vshrl.u32 %v1826_v10, 16  ;;  %v3089_v57 = vld [vmem:[%s3840_s2 + $0x210] sm:$0xff] }
  0xfd   : > { %v1875_v19 = vsel %vm3439_vm12, %v1870_v0, %v1874_v11  ;;  %v1328_v20 = vor.u32 %v1327_v2, %v1324_v1  ;;  %v1894_v27 = vshll.u32 %v1826_v10, 16  ;;  %v1889_v31 = vsel %vm3439_vm12, %v1884_v8, %v1888_v9  ;;  %v2064_v62 = vld [vmem:[#allocation2 + $0x10] sm:$0xe]  ;;  %v2065_v10 = vld [vmem:[#allocation2 + $0x18] sm:$0xe] }
  0xfe   : > { %v1416_v29 = vpack.c.b16 %v1409_v3, %v1408_v15  ;;  %v1905_v32 = vshrl.u32 %v1828_v14, 16  ;;  %v1908_v33 = vshll.u32 %v1828_v14, 16  ;;  %v1331_v25 = vshll.u32 %v3625_v6, 16  ;;  %v3090_v6 = vld [vmem:[%s3840_s2 + $0x218] sm:$0xff] }
  0xff   : > { %v2747_v36 = vrot.slane %v1513_v18, 9  ;;  %v1965_v39 = vunpack.c.l.b16 %v1875_v19  ;;  %v1317_v40 = vshll.u32 %v3630_v21, 16  ;;  %v1555_v30 = vrot.slane %v3661_v22, 5  ;;  %2205 = vmatpush.bf16.msrb.mxu0 %v3090_v6  ;;  %3115 = vmatpush.bf16.msra.mxu1 %v3090_v6 }
 0x100   : > { %v1966_v41 = vunpack.c.l.b16 %v1889_v31  ;;  %v1329_v42 = vrot.slane %v1328_v20, 4  ;;  %v1893_v44 = vrot.slane %v1891_v24, 4  ;;  %v1896_v47 = vrot.slane %v1894_v27, 5 }
 0x101   : > { %1654 = vmatmul.bf16.vlgmr.msrb.gmra.mxu2 %v1590_v12  ;;  %v1310_v12 = vrot.slane %v1308_v60, 4  ;;  %v1907_v5 = vrot.slane %v1905_v32, 4  ;;  %v1910_v21 = vrot.slane %v1908_v33, 5  ;;  %v2822_v52 = vor.u32 %v3068_v38, %v2821_v34  ;;  %v1832_v38 = vld [vmem:[#allocation2 + $0x48] sm:$0xf] }
 0x102   : > { %845 = vmatmul.bf16.gmra.mxu1 %v769_v17  ;;  %v3657_v17 = vld [vmem:[#allocation2 + $0x2c] sm:$0x1]  ;;  %v1900_v59 = vshll.u32 %v3672_v50, 16  ;;  %v1914_v60 = vshll.u32 %v3674_v51, 16  ;;  %v1336_v61 = vshrl.u32 %v1271_v49, 16  ;;  %v1972_v63 = vpack.c.b16 %v1966_v41, %v1965_v39 }
 0x103   : > { %v1314_v35 = vor.u32 %v1313_v13, %v1310_v12  ;;  %v1551_v37 = vrot.slane %v3657_v17, 5  ;;  %v1319_v0 = vrot.slane %v1317_v40, 5  ;;  %v1897_v2 = vor.u32 %v1896_v47, %v1893_v44  ;;  %2206 = vmatpush.bf16.msrb.mxu0 %v3089_v57  ;;  %3116 = vmatpush.bf16.msra.mxu1 %v3089_v57  ;;  %v1515_v41 = vld [vmem:[#allocation2 + $0x38] sm:$0xe] }
 0x104   : > { %v1911_v3 = vor.u32 %v1910_v21, %v1907_v5  ;;  %v1339_v4 = vshll.u32 %v1271_v49, 16  ;;  %v1350_v8 = vshrl.u32 %v1273_v56, 16  ;;  %v1353_v9 = vshll.u32 %v1273_v56, 16  ;;  %v3701_v49 = vld [vmem:[#allocation2 + $0x3c] sm:$0x1] }
 0x105   : > { %v1315_v53 = vrot.slane %v1314_v35, 4  ;;  %v1552_v55 = vsel %vm3420_vm11, %v2747_v36, %v1551_v37  ;;  %v2911_v14 = vrot.slane %v2064_v62, 9  ;;  %v1916_v18 = vrot.slane %v1914_v60, 5  ;;  %v1830_v37 = vld [vmem:[#allocation2 + $0x40] sm:$0xf] }
 0x106   : > { %v1586_v12 = vunpack.c.l.b16 %v1552_v55  ;;  %v1338_v19 = vrot.slane %v1336_v61, 4  ;;  %v1898_v20 = vrot.slane %v1897_v2, 4  ;;  %v2912_v24 = vrot.slane %v2065_v10, 9  ;;  %v3705_v5 = vld [vmem:[#allocation2 + $0x44] sm:$0x1]  ;;  %v3088_v61 = vld [vmem:[%s3840_s2 + $0x208] sm:$0xff] }
 0x107   : > { %v1320_v11 = vsel %vm3439_vm12, %v1315_v53, %v1319_v0  ;;  %v2094_v27 = vrot.slane %v3613_v45, 5  ;;  %v1341_v31 = vrot.slane %v1339_v4, 5  ;;  %v1352_v32 = vrot.slane %v1350_v8, 4  ;;  %v3069_v62 = vld [vmem:[#allocation2 + $0x34] sm:$0xf0]  ;;  %2207 = vmatpush.bf16.msrb.mxu0 %v3088_v61  ;;  %3117 = vmatpush.bf16.msra.mxu1 %v3088_v61  ;;  %v3087_v10 = vld [vmem:[%s3840_s2 + $0x200] sm:$0xff] }
 0x108   : > { %1789 = vmatmul.bf16.vlgmr.msra.gmra.mxu3 %v2818_v43  ;;  %2035 = vmatmul.bf16.vlgmr.msra.gmra.mxu0 %v1971_v54  ;;  %v2748_v43 = vrot.slane %v1514_v23, 9  ;;  %v1333_v54 = vrot.slane %v1331_v25, 5  ;;  %v2090_v23 = vrot.slane %v3617_v48, 5  ;;  %v1355_v33 = vrot.slane %v1353_v9, 5 }
 0x109   : > { %v1410_v34 = vunpack.c.l.b16 %v1320_v11  ;;  %v2095_v25 = vsel %vm3420_vm11, %v2912_v24, %v2094_v27  ;;  %v1345_v36 = vshll.u32 %v3657_v17, 16  ;;  %v1342_v44 = vor.u32 %v1341_v31, %v1338_v19  ;;  %v1516_v17 = vld [vmem:[#allocation2 + $0x40] sm:$0xe] }
 0x10a   : > { %v1556_v58 = vsel %vm3420_vm11, %v2748_v43, %v1555_v30  ;;  %v1334_v1 = vsel %vm3439_vm12, %v1329_v42, %v1333_v54  ;;  %v2091_v35 = vsel %vm3420_vm11, %v2911_v14, %v2090_v23  ;;  %v2138_v48 = vunpack.c.l.b16 %v2095_v25  ;;  %v1277_v14 = vld [vmem:[#allocation2 + $0x40] sm:$0xf]  ;;  %v3725_v23 = vld [vmem:[#allocation2 + $0x4c] sm:$0x1] }
 0x10b   : > { %v1587_v13 = vunpack.c.l.b16 %v1556_v58  ;;  %v1411_v15 = vunpack.c.l.b16 %v1334_v1  ;;  %v2137_v39 = vunpack.c.l.b16 %v2091_v35  ;;  %v1359_v30 = vshll.u32 %v3661_v22, 16  ;;  %v2825_v22 = vld [vmem:[#allocation2 + $0x30] sm:$0xf]  ;;  %2208 = vmatpush.bf16.msrb.mxu0 %v3087_v10  ;;  %3118 = vmatpush.bf16.msra.mxu1 %v3087_v10 }
 0x10c   : > { %v1356_v47 = vor.u32 %v1355_v33, %v1352_v32  ;;  %v1919_v21 = vshrl.u32 %v1830_v37, 16  ;;  %v1933_v53 = vshrl.u32 %v1832_v38, 16  ;;  %v1936_v54 = vshll.u32 %v1832_v38, 16 }
 0x10d   : > { %v1417_v40 = vpack.c.b16 %v1411_v15, %v1410_v34  ;;  %v1592_v43 = vpack.c.b16 %v1587_v13, %v1586_v12  ;;  %v3703_v6 = vpack.c.b16 %v2138_v48, %v2137_v39  ;;  %v1347_v55 = vrot.slane %v1345_v36, 5  ;;  %v1275_v13 = vld [vmem:[#allocation2 + $0x38] sm:$0xf] }
 0x10e   : > { %v2749_v56 = vrot.slane %v1515_v41, 9  ;;  %v1361_v58 = vrot.slane %v1359_v30, 5  ;;  %v2750_v60 = vrot.slane %v1516_v17, 9  ;;  %v1343_v0 = vrot.slane %v1342_v44, 4 }
 0x10f   : > { %v1357_v1 = vrot.slane %v1356_v47, 4  ;;  %v1563_v2 = vrot.slane %v3705_v5, 5  ;;  %v1935_v8 = vrot.slane %v1933_v53, 4  ;;  %v1938_v9 = vrot.slane %v1936_v54, 5 }
 0x110   : > { %v2826_v11 = vor.u32 %v3069_v62, %v2825_v22  ;;  %v1942_v31 = vshll.u32 %v3725_v23, 16  ;;  %v1364_v32 = vshrl.u32 %v1275_v13, 16  ;;  %v1367_v33 = vshll.u32 %v1275_v13, 16  ;;  %v3070_v22 = vld [vmem:[#allocation2 + $0x44] sm:$0xf0] }
 0x111   : > { %1659 = vmatmul.bf16.gmra.mxu2 %v1591_v16  ;;  %v1902_v16 = vrot.slane %v1900_v59, 5  ;;  %v1559_v59 = vrot.slane %v3701_v49, 5  ;;  %v1564_v19 = vsel %vm3420_vm11, %v2750_v60, %v1563_v2  ;;  %v1378_v34 = vshrl.u32 %v1277_v14, 16 }
 0x112   : > { %1480 = vmatmul.bf16.vlgmr.msrb.gmra.mxu1 %v1416_v29  ;;  %v1912_v29 = vrot.slane %v1911_v3, 4  ;;  %v1921_v3 = vrot.slane %v1919_v21, 4  ;;  %v1381_v35 = vshll.u32 %v1277_v14, 16  ;;  %v1589_v38 = vunpack.c.l.b16 %v1564_v19 }
 0x113   : > { %v1903_v45 = vsel %vm3439_vm12, %v1898_v20, %v1902_v16  ;;  %v1560_v12 = vsel %vm3420_vm11, %v2749_v56, %v1559_v59  ;;  %v1348_v16 = vsel %vm3439_vm12, %v1343_v0, %v1347_v55  ;;  %v3723_v20 = vld [vmem:[#allocation2 + $0x44] sm:$0x1]  ;;  %v1369_v30 = vrot.slane %v1367_v33, 5  ;;  %v2829_v56 = vld [vmem:[#allocation2 + $0x40] sm:$0xf] }
 0x114   : > { %v1917_v42 = vsel %vm3439_vm12, %v1912_v29, %v1916_v18  ;;  %v1967_v57 = vunpack.c.l.b16 %v1903_v45  ;;  %v1362_v18 = vsel %vm3439_vm12, %v1357_v1, %v1361_v58  ;;  %v1928_v27 = vshll.u32 %v3723_v20, 16  ;;  %v2069_v33 = vld [vmem:[#allocation2 + $0x38] sm:$0xe] }
 0x115   : > { %v1939_v29 = vor.u32 %v1938_v9, %v1935_v8  ;;  %v1412_v25 = vunpack.c.l.b16 %v1348_v16  ;;  %v1413_v36 = vunpack.c.l.b16 %v1362_v18  ;;  %v1366_v45 = vrot.slane %v1364_v32, 4  ;;  %v2067_v8 = vld [vmem:[#allocation2 + $0x28] sm:$0xe]  ;;  %v2068_v32 = vld [vmem:[#allocation2 + $0x30] sm:$0xe] }
 0x116   : > { %v1930_v48 = vrot.slane %v1928_v27, 5  ;;  %v1380_v41 = vrot.slane %v1378_v34, 4  ;;  %v1373_v53 = vshll.u32 %v3701_v49, 16  ;;  %v1387_v55 = vshll.u32 %v3705_v5, 16 }
 0x117   : > { %v1418_v44 = vpack.c.b16 %v1413_v36, %v1412_v25  ;;  %v2098_v10 = vrot.slane %v3640_v26, 5  ;;  %v2914_v13 = vrot.slane %v2067_v8, 9  ;;  %v2106_v25 = vrot.slane %v3672_v50, 5 }
 0x118   : > { %1794 = vmatmul.bf16.gmra.mxu3 %v2822_v52  ;;  %2040 = vmatmul.bf16.gmra.mxu0 %v1972_v63  ;;  %v1922_v52 = vshll.u32 %v1830_v37, 16  ;;  %v1968_v63 = vunpack.c.l.b16 %v1917_v42  ;;  %v1588_v37 = vunpack.c.l.b16 %v1560_v12  ;;  %v1383_v42 = vrot.slane %v1381_v35, 5 }
 0x119   : > { %v1375_v60 = vrot.slane %v1373_v53, 5  ;;  %v1389_v62 = vrot.slane %v1387_v55, 5  ;;  %v2915_v35 = vrot.slane %v2068_v32, 9  ;;  %v2916_v36 = vrot.slane %v2069_v33, 9 }
 0x11a   : > { %v1924_v4 = vrot.slane %v1922_v52, 5  ;;  %v1973_v15 = vpack.c.b16 %v1968_v63, %v1967_v57  ;;  %v1593_v47 = vpack.c.b16 %v1589_v38, %v1588_v37  ;;  %v1370_v52 = vor.u32 %v1369_v30, %v1366_v45 }
 0x11b   : > { %v1384_v54 = vor.u32 %v1383_v42, %v1380_v41  ;;  %v2830_v63 = vor.u32 %v3070_v22, %v2829_v56  ;;  %v2110_v37 = vrot.slane %v3674_v51, 5  ;;  %v2071_v51 = vld [vmem:[#allocation2 + $0x48] sm:$0xe]  ;;  %v2114_v55 = vrot.slane %v3723_v20, 5 }
 0x11c   : > { %v1925_v24 = vor.u32 %v1924_v4, %v1921_v3  ;;  %v1371_v59 = vrot.slane %v1370_v52, 4  ;;  %v2066_v4 = vld [vmem:[#allocation2 + $0x20] sm:$0xe]  ;;  %v2918_v56 = vrot.slane %v2071_v51, 9  ;;  %v2118_v22 = vrot.slane %v3725_v23, 5 }
 0x11d   : > { %v1385_v61 = vrot.slane %v1384_v54, 4  ;;  %v2913_v12 = vrot.slane %v2066_v4, 9 }
 0x11e   : > { %v1926_v39 = vrot.slane %v1925_v24, 4  ;;  %v1376_v49 = vsel %vm3439_vm12, %v1371_v59, %v1375_v60  ;;  %v2119_v60 = vsel %vm3420_vm11, %v2918_v56, %v2118_v22 }
 0x11f   : > { %v1390_v5 = vsel %vm3439_vm12, %v1385_v61, %v1389_v62  ;;  %v1414_v1 = vunpack.c.l.b16 %v1376_v49  ;;  %v2099_v28 = vsel %vm3420_vm11, %v2913_v12, %v2098_v10  ;;  %v2144_v49 = vunpack.c.l.b16 %v2119_v60 }
 0x120   : > { %v1931_v17 = vsel %vm3439_vm12, %v1926_v39, %v1930_v48  ;;  %v1415_v2 = vunpack.c.l.b16 %v1390_v5  ;;  %v2139_v19 = vunpack.c.l.b16 %v2099_v28  ;;  %v2107_v48 = vsel %vm3420_vm11, %v2915_v35, %v2106_v25 }
 0x121   : > { %1664 = vmatmul.bf16.gmra.mxu2 %v1592_v43  ;;  %v1944_v43 = vrot.slane %v1942_v31, 5  ;;  %v1969_v57 = vunpack.c.l.b16 %v1931_v17  ;;  %v2141_v45 = vunpack.c.l.b16 %v2107_v48 }
 0x122   : > { %1485 = vmatmul.bf16.gmra.mxu1 %v1417_v40  ;;  %v1940_v40 = vrot.slane %v1939_v29, 4  ;;  %v1419_v3 = vpack.c.b16 %v1415_v2, %v1414_v1 }
 0x124   : > { %v1945_v21 = vsel %vm3439_vm12, %v1940_v40, %v1944_v43  ;;  %v2111_v40 = vsel %vm3420_vm11, %v2916_v36, %v2110_v37 }
 0x125   : > { %v1970_v58 = vunpack.c.l.b16 %v1945_v21  ;;  %v2142_v30 = vunpack.c.l.b16 %v2111_v40  ;;  %v2070_v21 = vld [vmem:[#allocation2 + $0x40] sm:$0xe] }
 0x126   : > { %v2917_v54 = vrot.slane %v2070_v21, 9 }
 0x127   : > { %v1974_v0 = vpack.c.b16 %v1970_v58, %v1969_v57  ;;  %v2147_v17 = vpack.c.b16 %v2142_v30, %v2141_v45 }
 0x128   : > { %1799 = vmatmul.bf16.gmra.mxu3 %v2826_v11  ;;  %2045 = vmatmul.bf16.gmra.mxu0 %v1973_v15  ;;  %v2102_v11 = vrot.slane %v3647_v46, 5  ;;  %v2115_v59 = vsel %vm3420_vm11, %v2917_v54, %v2114_v55  ;;  %v3098_v55 = vld [vmem:[%s3841_s3 + $0x18] sm:$0xff] }
 0x12a   : > { %v2103_v15 = vsel %vm3420_vm11, %v2914_v13, %v2102_v11 }
 0x12b   : > { %v2140_v24 = vunpack.c.l.b16 %v2103_v15 }
 0x12d   : > { %v2146_v31 = vpack.c.b16 %v2140_v24, %v2139_v19 }
 0x131   : > { %1669 = vmatmul.bf16.gmra.mxu2 %v1593_v47 }
 0x132   : > { %1490 = vmatmul.bf16.gmra.mxu1 %v1418_v44 }
 0x138   : > { %1804 = vmatmul.bf16.gmra.mxu3 %v2830_v63  ;;  %2050 = vmatmul.bf16.gmra.mxu0 %v1974_v0  ;;  %v2143_v0 = vunpack.c.l.b16 %v2115_v59 }
 0x13a   : > { %v2148_v4 = vpack.c.b16 %v2144_v49, %v2143_v0 }
 0x142   : > { %1495 = vmatmul.bf16.gmra.mxu1 %v1419_v3 }
 0x143   : > { %v932_v9 = vpop.f32.mrf.mxu2 }
 0x145   : > { %v1235_v14 = vpop.f32.mrf.mxu0 }
 0x148   : > { %2209 = vmatmul.bf16.vlgmr.msrb.gmra.mxu0 %v3703_v6 }
 0x14b   : > { %v1101_v16 = vpop.f32.mrf.mxu3  ;;  %v934_v18 = vpop.f32.mrf.mxu2 }
 0x14d   : > { %v1237_v27 = vpop.f32.mrf.mxu0 }
 0x14f   : > { %v831_v29 = vpop.f32.mrf.mxu1 }
 0x150   : > { %v933_v26 = vadd.f32 %v932_v9, %v831_v29  ;;  %v3102_v29 = vld [vmem:[%s3841_s3 + $0x38] sm:$0xff] }
 0x151   : > { %2330 = vmatpush.bf16.msra.mxu2 %v3102_v29  ;;  %3119 = vmatpush.bf16.msrb.mxu3 %v3102_v29  ;;  %v3137_v29 = vld [vmem:[%s3843_s5] ss:$0 sm:$0xff] }
 0x152   : > { %v1121_v46 = vadd.f32 %v1101_v16, %v933_v26  ;;  %2214 = vmatmul.bf16.vlgmr.msra.gmra.mxu1 %v2146_v31 }
 0x153   : > { %v1103_v34 = vpop.f32.mrf.mxu3 }
 0x154   : > { %v937_v6 = vpop.f32.mrf.mxu2  ;;  %v1255_v61 = vadd.f32 %v1235_v14, %v1121_v46 }
 0x155   : > { %v1240_v38 = vpop.f32.mrf.mxu0 }
 0x157   : > { %v833_v39 = vpop.f32.mrf.mxu1 }
 0x158   : > { %v935_v63 = vadd.f32 %v934_v18, %v833_v39 }
 0x15a   : > { %v1122_v20 = vadd.f32 %v1103_v34, %v935_v63  ;;  %v3101_v34 = vld [vmem:[%s3841_s3 + $0x30] sm:$0xff] }
 0x15b   : > { %v1106_v43 = vpop.f32.mrf.mxu3  ;;  %2331 = vmatpush.bf16.msra.mxu2 %v3101_v34  ;;  %3120 = vmatpush.bf16.msrb.mxu3 %v3101_v34 }
 0x15c   : > { %v939_v41 = vpop.f32.mrf.mxu2  ;;  %v3758_v9 = vadd.f32 %v1237_v27, %v1122_v20 }
 0x15d   : > { %v1242_v42 = vpop.f32.mrf.mxu0 }
 0x15f   : > { %v836_v44 = vpop.f32.mrf.mxu1 }
 0x160   : > { %v938_v47 = vadd.f32 %v937_v6, %v836_v44 }
 0x162   : > { %v1123_v50 = vadd.f32 %v1106_v43, %v938_v47  ;;  %2219 = vmatmul.bf16.gmra.mxu1 %v2147_v17 }
 0x163   : > { %v1108_v52 = vpop.f32.mrf.mxu3 }
 0x164   : > { %v942_v53 = vpop.f32.mrf.mxu2  ;;  %v1257_v14 = vadd.f32 %v1240_v38, %v1123_v50  ;;  %v3100_v38 = vld [vmem:[%s3841_s3 + $0x28] sm:$0xff] }
 0x165   : > { %v1245_v57 = vpop.f32.mrf.mxu0  ;;  %2332 = vmatpush.bf16.msra.mxu2 %v3100_v38  ;;  %3121 = vmatpush.bf16.msrb.mxu3 %v3100_v38 }
 0x167   : > { %v838_v58 = vpop.f32.mrf.mxu1 }
 0x168   : > { %v940_v13 = vadd.f32 %v939_v41, %v838_v58  ;;  %v3099_v41 = vld [vmem:[%s3841_s3 + $0x20] sm:$0xff] }
 0x169   : > { %2333 = vmatpush.bf16.msra.mxu2 %v3099_v41  ;;  %3122 = vmatpush.bf16.msrb.mxu3 %v3099_v41 }
 0x16a   : > { %v1124_v16 = vadd.f32 %v1108_v52, %v940_v13 }
 0x16b   : > { %v1111_v62 = vpop.f32.mrf.mxu3 }
 0x16c   : > { %v944_v5 = vpop.f32.mrf.mxu2  ;;  %v3763_v26 = vadd.f32 %v1242_v42, %v1124_v16 }
 0x16d   : > { %v1247_v1 = vpop.f32.mrf.mxu0  ;;  %2334 = vmatpush.bf16.msra.mxu2 %v3098_v55  ;;  %3123 = vmatpush.bf16.msrb.mxu3 %v3098_v55 }
 0x16f   : > { %v841_v2 = vpop.f32.mrf.mxu1 }
 0x170   : > { %v943_v3 = vadd.f32 %v942_v53, %v841_v2 }
 0x172   : > { %v1125_v23 = vadd.f32 %v1111_v62, %v943_v3  ;;  %2224 = vmatmul.bf16.gmra.mxu1 %v2148_v4  ;;  %v3096_v3 = vld [vmem:[%s3841_s3 + $0x8] sm:$0xff] }
 0x173   : > { %v1113_v8 = vpop.f32.mrf.mxu3 }
 0x174   : > { %v947_v7 = vpop.f32.mrf.mxu2  ;;  %v1259_v6 = vadd.f32 %v1245_v57, %v1125_v23 }
 0x175   : > { %v1250_v10 = vpop.f32.mrf.mxu0 }
 0x177   : > { %v843_v11 = vpop.f32.mrf.mxu1 }
 0x178   : > { %v945_v33 = vadd.f32 %v944_v5, %v843_v11  ;;  %v3095_v11 = vld [vmem:[%s3841_s3] sm:$0xff] }
 0x17a   : > { %v1126_v37 = vadd.f32 %v1113_v8, %v945_v33 }
 0x17b   : > { %v1116_v12 = vpop.f32.mrf.mxu3 }
 0x17c   : > { %v949_v19 = vpop.f32.mrf.mxu2  ;;  %v3773_v39 = vadd.f32 %v1247_v1, %v1126_v37 }
 0x17d   : > { %v1252_v28 = vpop.f32.mrf.mxu0 }
 0x17f   : > { %v846_v15 = vpop.f32.mrf.mxu1 }
 0x180   : > { %v948_v18 = vadd.f32 %v947_v7, %v846_v15 }
 0x182   : > { %v1127_v24 = vadd.f32 %v1116_v12, %v948_v18 }
 0x183   : > { %v1118_v27 = vpop.f32.mrf.mxu3 }
 0x184   : > { %v1655_v32 = vpop.f32.mrf.mxu2  ;;  %v3778_v42 = vadd.f32 %v1250_v10, %v1127_v24 }
 0x185   : > { %v2036_v31 = vpop.f32.mrf.mxu0 }
 0x187   : > { %v848_v46 = vpop.f32.mrf.mxu1 }
 0x188   : > { %v950_v30 = vadd.f32 %v949_v19, %v848_v46 }
 0x18a   : > { %v1128_v50 = vadd.f32 %v1118_v27, %v950_v30 }
 0x18b   : > { %v1790_v36 = vpop.f32.mrf.mxu3 }
 0x18c   : > { %v1657_v48 = vpop.f32.mrf.mxu2  ;;  %v3785_v56 = vadd.f32 %v1252_v28, %v1128_v50 }
 0x18d   : > { %v3768_v35 = vpop.f32.mrf.mxu0 }
 0x18f   : > { %v1481_v25 = vpop.f32.mrf.mxu1 }
 0x190   : > { %v1501_v21 = vadd.f32 %v1481_v25, %v1255_v61  ;;  %v3097_v61 = vld [vmem:[%s3841_s3 + $0x10] sm:$0xff] }
 0x191   : > { %2335 = vmatpush.bf16.msra.mxu2 %v3097_v61  ;;  %3124 = vmatpush.bf16.msrb.mxu3 %v3097_v61 }
 0x192   : > { %v1675_v53 = vadd.f32 %v1655_v32, %v1501_v21 }
 0x193   : > { %v1792_v45 = vpop.f32.mrf.mxu3 }
 0x194   : > { %v1660_v47 = vpop.f32.mrf.mxu2  ;;  %v1810_v58 = vadd.f32 %v1790_v36, %v1675_v53 }
 0x195   : > { %v2041_v40 = vpop.f32.mrf.mxu0  ;;  %2336 = vmatpush.bf16.msra.mxu2 %v3096_v3  ;;  %3125 = vmatpush.bf16.msrb.mxu3 %v3096_v3 }
 0x196   : > { %v2056_v62 = vadd.f32 %v2036_v31, %v1810_v58 }
 0x197   : > { %v1483_v43 = vpop.f32.mrf.mxu1 }
 0x199   : > { %2337 = vmatpush.bf16.msra.mxu2 %v3095_v11  ;;  %3126 = vmatpush.bf16.msrb.mxu3 %v3095_v11 }
 0x19b   : > { %v1795_v52 = vpop.f32.mrf.mxu3 }
 0x19c   : > { %v1662_v60 = vpop.f32.mrf.mxu2 }
 0x19d   : > { %v3780_v44 = vpop.f32.mrf.mxu0 }
 0x19f   : > { %v1486_v17 = vpop.f32.mrf.mxu1 }
 0x1a0   : > { %v1503_v51 = vadd.f32 %v1486_v17, %v1257_v14  ;;  %v1502_v14 = vadd.f32 %v1483_v43, %v3758_v9 }
 0x1a2   : > { %v1677_v54 = vadd.f32 %v1660_v47, %v1503_v51  ;;  %v1676_v28 = vadd.f32 %v1657_v48, %v1502_v14 }
 0x1a3   : > { %v1797_v0 = vpop.f32.mrf.mxu3 }
 0x1a4   : > { %v1812_v59 = vadd.f32 %v1795_v52, %v1677_v54  ;;  %v1665_v2 = vpop.f32.mrf.mxu2  ;;  %v1811_v18 = vadd.f32 %v1792_v45, %v1676_v28 }
 0x1a5   : > { %v2046_v22 = vpop.f32.mrf.mxu0 }
 0x1a6   : > { %v2058_v63 = vadd.f32 %v2041_v40, %v1812_v59  ;;  %v2057_v27 = vadd.f32 %v3768_v35, %v1811_v18  ;;  %v3139_v18 = vld [vmem:[%s3239_s26] sm:$0xff] }
 0x1a7   : > { %v1488_v57 = vpop.f32.mrf.mxu1 }
 0x1a8   : > { %v1504_v19 = vadd.f32 %v1488_v57, %v3763_v26 }
 0x1aa   : > { %v1678_v31 = vadd.f32 %v1662_v60, %v1504_v19 }
 0x1ab   : > { %v1800_v23 = vpop.f32.mrf.mxu3 }
 0x1ac   : > { %v1813_v9 = vadd.f32 %v1797_v0, %v1678_v31  ;;  %v1667_v45 = vpop.f32.mrf.mxu2 }
 0x1ad   : > { %v2048_v49 = vpop.f32.mrf.mxu0 }
 0x1ae   : > { %v2059_v26 = vadd.f32 %v3780_v44, %v1813_v9 }
 0x1af   : > { %v1491_v5 = vpop.f32.mrf.mxu1 }
 0x1b0   : > { %v1505_v1 = vadd.f32 %v1491_v5, %v1259_v6 }
 0x1b2   : > { %v1679_v20 = vadd.f32 %v1665_v2, %v1505_v1 }
 0x1b3   : > { %v1802_v17 = vpop.f32.mrf.mxu3 }
 0x1b4   : > { %v1814_v10 = vadd.f32 %v1800_v23, %v1679_v20  ;;  %v1670_v53 = vpop.f32.mrf.mxu2 }
 0x1b5   : > { %v3793_v4 = vpop.f32.mrf.mxu0 }
 0x1b6   : > { %v2060_v7 = vadd.f32 %v2046_v22, %v1814_v10 }
 0x1b7   : > { %v1493_v8 = vpop.f32.mrf.mxu1 }
 0x1b8   : > { %v1506_v35 = vadd.f32 %v1493_v8, %v3773_v39 }
 0x1ba   : > { %v1680_v50 = vadd.f32 %v1667_v45, %v1506_v35 }
 0x1bb   : > { %v1805_v22 = vpop.f32.mrf.mxu3 }
 0x1bc   : > { %v1815_v52 = vadd.f32 %v1802_v17, %v1680_v50  ;;  %v1672_v0 = vpop.f32.mrf.mxu2  ;;  %v3144_v50 = vld [vmem:[%s3239_s26 + $0x28] sm:$0xff] }
 0x1bd   : > { %v2053_v12 = vpop.f32.mrf.mxu0 }
 0x1be   : > { %v2061_v44 = vadd.f32 %v2048_v49, %v1815_v52 }
 0x1bf   : > { %v1496_v13 = vpop.f32.mrf.mxu1 }
 0x1c0   : > { %v1507_v55 = vadd.f32 %v1496_v13, %v3778_v42 }
 0x1c2   : > { %v1681_v60 = vadd.f32 %v1670_v53, %v1507_v55 }
 0x1c3   : > { %v1807_v3 = vpop.f32.mrf.mxu3 }
 0x1c4   : > { %v1816_v5 = vadd.f32 %v1805_v22, %v1681_v60  ;;  %v3146_v22 = vld [vmem:[%s3239_s26 + $0x38] sm:$0xff] }
 0x1c5   : > { %v2210_v15 = vpop.f32.mrf.mxu0 }
 0x1c6   : > { %v2230_v24 = vadd.f32 %v2210_v15, %v2056_v62  ;;  %v2062_v42 = vadd.f32 %v3793_v4, %v1816_v5  ;;  %v3138_v15 = vld [vmem:[%s3844_s6] ss:$0 sm:$0xff] }
 0x1c7   : > { %v1498_v16 = vpop.f32.mrf.mxu1 }
 0x1c8   : > { %v2242_v32 = vadd.f32 %v3137_v29, %v2230_v24  ;;  %v1508_v39 = vadd.f32 %v1498_v16, %v3785_v56 }
 0x1ca   : > { %v2250_v25 = vmax.f32 %v2242_v32, 0.0  ;;  %v1682_v1 = vadd.f32 %v1672_v0, %v1508_v39 }
 0x1cc   : > { %v1817_v23 = vadd.f32 %v1807_v3, %v1682_v1 }
 0x1cd   : > { %v2212_v46 = vpop.f32.mrf.mxu0 }
 0x1ce   : > { %v2231_v34 = vadd.f32 %v2212_v46, %v2057_v27  ;;  %v2063_v8 = vadd.f32 %v2053_v12, %v1817_v23  ;;  %v3140_v27 = vld [vmem:[%s3239_s26 + $0x8] sm:$0xff] }
 0x1cf   : > { %v2215_v33 = vpop.f32.mrf.mxu1 }
 0x1d0   : > { %v2243_v6 = vadd.f32 %v3137_v29, %v2231_v34  ;;  %v2232_v37 = vadd.f32 %v2215_v33, %v2058_v63  ;;  %v3141_v34 = vld [vmem:[%s3239_s26 + $0x10] sm:$0xff] }
 0x1d2   : > { %v2251_v36 = vmax.f32 %v2243_v6, 0.0  ;;  %v2244_v40 = vadd.f32 %v3137_v29, %v2232_v37  ;;  %v3142_v37 = vld [vmem:[%s3239_s26 + $0x18] sm:$0xff] }
 0x1d4   : > { %v2258_v38 = vpack.c.bf16 %v2251_v36, %v2250_v25  ;;  %v2252_v41 = vmax.f32 %v2244_v40, 0.0 }
 0x1d6   : > { %2338 = vmatmul.bf16.vlgmr.msra.gmra.mxu2 %v2258_v38 }
 0x1d7   : > { %v2217_v48 = vpop.f32.mrf.mxu1 }
 0x1d8   : > { %v2233_v43 = vadd.f32 %v2217_v48, %v2059_v26 }
 0x1da   : > { %v2245_v30 = vadd.f32 %v3137_v29, %v2233_v43  ;;  %v3143_v43 = vld [vmem:[%s3239_s26 + $0x20] sm:$0xff] }
 0x1dc   : > { %v2253_v47 = vmax.f32 %v2245_v30, 0.0 }
 0x1de   : > { %v2259_v21 = vpack.c.bf16 %v2253_v47, %v2252_v41 }
 0x1df   : > { %v2220_v51 = vpop.f32.mrf.mxu1 }
 0x1e0   : > { %v2234_v54 = vadd.f32 %v2220_v51, %v2060_v7  ;;  %v3145_v51 = vld [vmem:[%s3239_s26 + $0x30] sm:$0xff] }
 0x1e2   : > { %v2246_v58 = vadd.f32 %v3137_v29, %v2234_v54 }
 0x1e4   : > { %v2254_v62 = vmax.f32 %v2246_v58, 0.0 }
 0x1e6   : > { %2343 = vmatmul.bf16.gmra.mxu2 %v2259_v21 }
 0x1e7   : > { %v2222_v57 = vpop.f32.mrf.mxu1 }
 0x1e8   : > { %v2235_v59 = vadd.f32 %v2222_v57, %v2061_v44 }
 0x1ea   : > { %v2247_v61 = vadd.f32 %v3137_v29, %v2235_v59 }
 0x1ec   : > { %v2255_v63 = vmax.f32 %v2247_v61, 0.0 }
 0x1ee   : > { %v2260_v2 = vpack.c.bf16 %v2255_v63, %v2254_v62 }
 0x1ef   : > { %v2225_v20 = vpop.f32.mrf.mxu1 }
 0x1f0   : > { %v2236_v49 = vadd.f32 %v2225_v20, %v2062_v42 }
 0x1f2   : > { %v2248_v11 = vadd.f32 %v3137_v29, %v2236_v49 }
 0x1f4   : > { %v2256_v13 = vmax.f32 %v2248_v11, 0.0 }
 0x1f6   : > { %2348 = vmatmul.bf16.gmra.mxu2 %v2260_v2 }
 0x1f7   : > { %v2227_v10 = vpop.f32.mrf.mxu1 }
 0x1f8   : > { %v2237_v56 = vadd.f32 %v2227_v10, %v2063_v8 }
 0x1fa   : > { %v2249_v7 = vadd.f32 %v3137_v29, %v2237_v56 }
 0x1fc   : > { %v2257_v14 = vmax.f32 %v2249_v7, 0.0 }
 0x1fe   : > { %v2261_v28 = vpack.c.bf16 %v2257_v14, %v2256_v13 }
 0x200   : > { %2353 = vmatmul.bf16.vlgmr.msrb.gmra.mxu3 %v2261_v28 }
 0x259   : > { %v2339_v16 = vpop.f32.mrf.mxu2 }
 0x25a   : > { %v2340_v4 = vadd.f32 %v3138_v15, %v2339_v16 }
 0x25c   : > { %v2359_v19 = vadd.f32 %v3139_v18, %v2340_v4 }
 0x25e   : > { %v2367_v12 = vmax.f32 %v2359_v19, 0.0 }
 0x260   : > { %2375 = vst [vmem:[%s3818_s19] sm:$0xff] %v2367_v12 }
 0x261   : > { %v2341_v24 = vpop.f32.mrf.mxu2 }
 0x262   : > { %v2342_v29 = vadd.f32 %v3138_v15, %v2341_v24 }
 0x264   : > { %v2360_v31 = vadd.f32 %v3140_v27, %v2342_v29 }
 0x266   : > { %v2368_v46 = vmax.f32 %v2360_v31, 0.0 }
 0x268   : > { %2376 = vst [vmem:[%s3818_s19 + $0x8] sm:$0xff] %v2368_v46 }
 0x269   : > { %v2344_v32 = vpop.f32.mrf.mxu2 }
 0x26a   : > { %v2345_v33 = vadd.f32 %v3138_v15, %v2344_v32 }
 0x26c   : > { %v2361_v6 = vadd.f32 %v3141_v34, %v2345_v33 }
 0x26e   : > { %v2369_v9 = vmax.f32 %v2361_v6, 0.0 }
 0x270   : > { %2377 = vst [vmem:[%s3818_s19 + $0x10] sm:$0xff] %v2369_v9 }
 0x271   : > { %v2346_v25 = vpop.f32.mrf.mxu2 }
 0x272   : > { %v2347_v36 = vadd.f32 %v3138_v15, %v2346_v25 }
 0x274   : > { %v2362_v38 = vadd.f32 %v3142_v37, %v2347_v36 }
 0x276   : > { %v2370_v26 = vmax.f32 %v2362_v38, 0.0 }
 0x278   : > { %2378 = vst [vmem:[%s3818_s19 + $0x18] sm:$0xff] %v2370_v26 }
 0x279   : > { %v2349_v48 = vpop.f32.mrf.mxu2 }
 0x27a   : > { %v2350_v40 = vadd.f32 %v3138_v15, %v2349_v48 }
 0x27c   : > { %v2363_v45 = vadd.f32 %v3143_v43, %v2350_v40 }
 0x27e   : > { %v2371_v35 = vmax.f32 %v2363_v45, 0.0 }
 0x280   : > { %2379 = vst [vmem:[%s3818_s19 + $0x20] sm:$0xff] %v2371_v35 }
 0x281   : > { %v2351_v30 = vpop.f32.mrf.mxu2 }
 0x282   : > { %v2352_v47 = vadd.f32 %v3138_v15, %v2351_v30 }
 0x283   : > { %v2354_v41 = vpop.f32.mrf.mxu3 }
 0x284   : > { %v2355_v17 = vadd.f32 %v3138_v15, %v2354_v41  ;;  %v2364_v21 = vadd.f32 %v3144_v50, %v2352_v47 }
 0x286   : > { %v2365_v52 = vadd.f32 %v3145_v51, %v2355_v17  ;;  %v2372_v53 = vmax.f32 %v2364_v21, 0.0 }
 0x288   : > { %v2373_v54 = vmax.f32 %v2365_v52, 0.0  ;;  %2380 = vst [vmem:[%s3818_s19 + $0x28] sm:$0xff] %v2372_v53 }
 0x28a   : > { %2381 = vst [vmem:[%s3818_s19 + $0x30] sm:$0xff] %v2373_v54 }
 0x28b   : > { %v2356_v55 = vpop.f32.mrf.mxu3 }
 0x28c   : > { %v2357_v44 = vadd.f32 %v3138_v15, %v2356_v55 }
 0x28e   : > { %v2366_v57 = vadd.f32 %v3146_v22, %v2357_v44 }
 0x290   : > { %v2374_v58 = vmax.f32 %v2366_v57, 0.0 }
 0x292   : > { %2382 = vst [vmem:[%s3818_s19 + $0x38] sm:$0xff] %v2374_v58 }
 0x293 PF: > { %s17_s24 = sadd.s32 1, %s3153_s24  }
 0x294   : > { %p14_p4 = scmp.ge.s32.totalorder %s17_s24, 4  }
 0x296   :  { %16 = sbr.rel (!%p14_p4) target bundleno = 1 (0x1), region = 89 }

</bundles_post_ra>
